<compile_context>
chip_gen: v5e
topology: v5e:2x2
jax: 0.10.0
libtpu: 0.0.40
codegen_flags: <defaults>
</compile_context>

<pallas_src>
import math
import functools

import jax
import jax.numpy as jnp
from jax import lax
from jax.experimental import pallas as pl
from jax.experimental.pallas import tpu as pltpu


def _readout_attn_kernel(res_ref, tok_ref, wq_ref, wkv_ref, wo_ref, bo_ref,
                         out_ref, q_scr, kv_scr, ctx_scr, *, n_heads: int,
                         d_k: int, approx_recip: bool):
    """Refs (per grid step):
       res_ref : (Bt, Lq, D)      residual_state block
       tok_ref : (Bt, Lk, D)      token_embeddings block
       wq_ref  : (D, D)           q_proj weight, (out, in), 1/sqrt(d_k) folded in
       wkv_ref : (2D, D)          stacked [k_proj; v_proj] weights, (out, in)
       wo_ref  : (D, D)           out_proj weight, (out, in)
       bo_ref  : (1, D)           out_proj bias (f32)
       out_ref : (Bt, Lq, D)      output block
       q_scr   : (Bt, Lq, D)      VMEM scratch, compute dtype
       kv_scr  : (Bt, Lk, 2D)     VMEM scratch, compute dtype
       ctx_scr : (Bt*Lq, D)       VMEM scratch, staged per-head attention output
    """
    Bt, Lq, D = res_ref.shape
    _, Lk, _ = tok_ref.shape
    cdt = res_ref.dtype  # MXU operand dtype (bf16 by default, set by wrapper)

    # y = x @ W.T  -> contract dim 1 of both operands (MXU-native, no transpose).
    dn = (((1,), (1,)), ((), ()))

    res2d = res_ref[...].reshape(Bt * Lq, D)
    tok2d = tok_ref[...].reshape(Bt * Lk, D)

    # Q projection (scale already folded into the weight by the wrapper).
    q = lax.dot_general(res2d, wq_ref[...], dn, preferred_element_type=jnp.float32)
    q_scr[...] = q.reshape(Bt, Lq, D).astype(cdt)

    # Fused K/V projection: one (M, D) x (D, 2D) matmul -> N = 2D fills the
    # 256-wide MXU on v6e/v7x and halves weight pushes vs. two separate dots.
    kv = lax.dot_general(tok2d, wkv_ref[...], dn, preferred_element_type=jnp.float32)
    kv_scr[...] = kv.reshape(Bt, Lk, 2 * D).astype(cdt)

    # Per-head attention (tiny matmuls, latency-bound; the heavy FLOPs live in
    # the projections above and the single out-proj below).
    for h in range(n_heads):
        lo = h * d_k
        q_h = q_scr[:, :, lo:lo + d_k]                  # (Bt, Lq, d_k)
        k_h = kv_scr[:, :, lo:lo + d_k]                 # (Bt, Lk, d_k)
        v_h = kv_scr[:, :, D + lo:D + lo + d_k]         # (Bt, Lk, d_k)

        scores = jnp.einsum("bqd,bkd->bqk", q_h, k_h,
                            preferred_element_type=jnp.float32)   # (Bt, Lq, Lk)
        m = jnp.max(scores, axis=-1, keepdims=True)
        p = jnp.exp(scores - m)
        denom = jnp.sum(p, axis=-1, keepdims=True)
        if approx_recip:
            attn = p * pl.reciprocal(denom, approx=True)          # EUP recip (bf16 path)
        else:
            attn = p / denom                                      # exact (f32 path)

        head_out = jnp.einsum("bqk,bkd->bqd", attn.astype(cdt), v_h,
                              preferred_element_type=jnp.float32)  # (Bt, Lq, d_k)

        # Stage this head's output at its lane offset (masked 32-lane stores;
        # the store slot has slack), instead of a K=d_k out-proj dot per head.
        ctx_scr[:, lo:lo + d_k] = head_out.reshape(Bt * Lq, d_k).astype(cdt)

    # One full-contraction (K=D) output projection + bias.
    out = lax.dot_general(ctx_scr[...], wo_ref[...], dn,
                          preferred_element_type=jnp.float32)
    out = out + bo_ref[...].astype(jnp.float32)
    out_ref[...] = out.reshape(Bt, Lq, D).astype(out_ref.dtype)


def _choose_batch_tile(B, Lq, Lk, D, in_bytes, out_bytes, *,
                       target_rows: int = 512,
                       act_budget_bytes: int = 24 << 20):
    """Largest divisor of B whose blocks fit the activation VMEM budget and keep
    the fused projection rows near the MXU sweet spot.  Deliberately does NOT
    shrink Bt just to obtain >=2 grid steps: at small B*L the extra grid steps
    cost more (~0.35us each) than any megacore split saves."""
    def act_bytes(bt):
        blocks = 2 * bt * (Lq + Lk) * D * in_bytes        # res + tok, double-buffered
        blocks += 2 * bt * Lq * D * out_bytes             # out, double-buffered
        scratch = bt * (Lq * D + Lk * 2 * D + Lq * D) * in_bytes
        return blocks + scratch

    divisors = [d for d in range(1, B + 1) if B % d == 0]
    fits = [d for d in divisors
            if d * max(Lq, 1) <= target_rows and act_bytes(d) <= act_budget_bytes]
    bt = max(fits) if fits else 1
    return bt, act_bytes(bt)


def _make_call(B, Bt, Lq, Lk, D, n_heads, d_k, compute_dtype, out_dtype,
               approx_recip, weight_pipeline_mode, vmem_limit_bytes):
    kernel = functools.partial(_readout_attn_kernel, n_heads=n_heads, d_k=d_k,
                               approx_recip=approx_recip)

    def wspec(shape):
        idx = lambda b, n=len(shape): (0,) * n
        if weight_pipeline_mode is None:
            return pl.BlockSpec(shape, idx)
        # Constant index_map -> single-buffer to halve the weights' VMEM footprint.
        return pl.BlockSpec(shape, idx, pipeline_mode=weight_pipeline_mode)

    grid_spec = pltpu.PrefetchScalarGridSpec(
        num_scalar_prefetch=0,
        grid=(B // Bt,),
        in_specs=[
            pl.BlockSpec((Bt, Lq, D), lambda b: (b, 0, 0)),   # residual block
            pl.BlockSpec((Bt, Lk, D), lambda b: (b, 0, 0)),   # token block
            wspec((D, D)),                                    # wq (pre-scaled)
            wspec((2 * D, D)),                                # stacked wk/wv
            wspec((D, D)),                                    # wo
            wspec((1, D)),                                    # bias
        ],
        out_specs=pl.BlockSpec((Bt, Lq, D), lambda b: (b, 0, 0)),
        scratch_shapes=[
            pltpu.VMEM((Bt, Lq, D), compute_dtype),           # q
            pltpu.VMEM((Bt, Lk, 2 * D), compute_dtype),       # kv
            pltpu.VMEM((Bt * Lq, D), compute_dtype),          # staged head outputs
        ],
    )

    return pl.pallas_call(
        kernel,
        out_shape=jax.ShapeDtypeStruct((B, Lq, D), out_dtype),
        grid_spec=grid_spec,
        compiler_params=pltpu.CompilerParams(
            dimension_semantics=("parallel",),
            vmem_limit_bytes=vmem_limit_bytes),
    )


def readout_attention(residual_state, token_embeddings, params, *, n_heads: int,
                      compute_dtype=jnp.bfloat16, out_dtype=None):
    """JAX wrapper reproducing ReadoutAttention.forward (inference) semantics."""
    B, Lq, D = residual_state.shape
    _, Lk, _ = token_embeddings.shape
    assert D % n_heads == 0
    d_k = D // n_heads
    scale = 1.0 / math.sqrt(d_k)
    if out_dtype is None:
        out_dtype = residual_state.dtype

    # PyTorch slices the result to the first seq_len rows when seq_len < Lq;
    # query rows are independent, so simply don't compute the discarded rows.
    if Lk <= Lq:
        residual_state = residual_state[:, :Lk, :]
        Lq_eff = Lk
    else:
        Lq_eff = Lq

    x_res = residual_state.astype(compute_dtype)
    x_tok = token_embeddings.astype(compute_dtype)
    # Fold 1/sqrt(d_k) into Wq once (one-time weight transform, no per-call op).
    wq = (params["wq"] * scale).astype(compute_dtype)          # (D, D), (out, in)
    # Stack K/V weights -> one fused N=2D projection matmul in the kernel.
    wkv = jnp.concatenate([params["wk"], params["wv"]], axis=0).astype(compute_dtype)
    wo = params["wo"].astype(compute_dtype)                    # (D, D), (out, in)
    bo = params["bo"].reshape(1, D).astype(jnp.float32)

    in_bytes = jnp.dtype(compute_dtype).itemsize
    out_bytes = jnp.dtype(out_dtype).itemsize
    Bt, act_bytes = _choose_batch_tile(B, Lq_eff, Lk, D, in_bytes, out_bytes)

    # Explicit scoped-VMEM limit derived from the actual footprint (+2x headroom),
    # clamped to stay portable across v5e (16 MiB default) / v6e / v7x (64 MiB phys).
    weight_bytes = (4 * D * D) * in_bytes + 4 * D
    vmem_limit = int(min(max(2 * (act_bytes + 2 * weight_bytes), 32 << 20), 48 << 20))

    approx_recip = jnp.dtype(compute_dtype) != jnp.dtype(jnp.float32)
    args = (x_res, x_tok, wq, wkv, wo, bo)

    try:
        call = _make_call(B, Bt, Lq_eff, Lk, D, n_heads, d_k, compute_dtype,
                          out_dtype, approx_recip, pl.Buffered(1), vmem_limit)
        out = call(*args)
    except Exception:
        # Portability guard: if single-buffering the constant weight specs is
        # rejected on this jax version, fall back to default buffering.
        call = _make_call(B, Bt, Lq_eff, Lk, D, n_heads, d_k, compute_dtype,
                          out_dtype, approx_recip, None, vmem_limit)
        out = call(*args)

    # Length reconciliation (matches PyTorch zero-padding when seq_len > Lq).
    if Lk > Lq:
        pad = jnp.zeros((B, Lk - Lq, D), dtype=out.dtype)
        out = jnp.concatenate([out, pad], axis=1)
    return out


def _reference(residual_state, token_embeddings, params, *, n_heads):
    """Pure-JAX float32 reference for verification."""
    B, Lq, D = residual_state.shape
    _, Lk, _ = token_embeddings.shape
    d_k = D // n_heads
    q = residual_state @ params["wq"].T
    k = token_embeddings @ params["wk"].T
    v = token_embeddings @ params["wv"].T
    q = q.reshape(B, Lq, n_heads, d_k).transpose(0, 2, 1, 3)
    k = k.reshape(B, Lk, n_heads, d_k).transpose(0, 2, 1, 3)
    v = v.reshape(B, Lk, n_heads, d_k).transpose(0, 2, 1, 3)
    scores = jnp.einsum("bhqd,bhkd->bhqk", q, k) / math.sqrt(d_k)
    w = jax.nn.softmax(scores, axis=-1)
    out = jnp.einsum("bhqk,bhkd->bhqd", w, v)
    out = out.transpose(0, 2, 1, 3).reshape(B, Lq, D)
    out = out @ params["wo"].T + params["bo"]
    if Lq != Lk:
        if Lk <= Lq:
            out = out[:, :Lk, :]
        else:
            pad = jnp.zeros((B, Lk - Lq, D), dtype=out.dtype)
            out = jnp.concatenate([out, pad], axis=1)
    return out


if __name__ == "__main__":
    # Small, deterministic example shapes.  d_model is a multiple of 128 so the
    # kernel's output stores are lane-dense.
    B = 2
    D = 128         # d_model
    H = 4           # n_heads  (d_k = 32)
    LQ = 8          # fixed_kv_length (residual_state length)
    LK = 12         # seq_len (token_embeddings length) -> exercises padding path

    key = jax.random.PRNGKey(0)
    keys = jax.random.split(key, 7)
    residual_state = jax.random.normal(keys[0], (B, LQ, D), dtype=jnp.float32)
    token_embeddings = jax.random.normal(keys[1], (B, LK, D), dtype=jnp.float32)

    wscale = 1.0 / math.sqrt(D)
    params = {
        "wq": jax.random.uniform(keys[2], (D, D), minval=-wscale, maxval=wscale),
        "wk": jax.random.uniform(keys[3], (D, D), minval=-wscale, maxval=wscale),
        "wv": jax.random.uniform(keys[4], (D, D), minval=-wscale, maxval=wscale),
        "wo": jax.random.uniform(keys[5], (D, D), minval=-wscale, maxval=wscale),
        "bo": jax.random.uniform(keys[6], (D,), minval=-wscale, maxval=wscale),
    }

    ref = _reference(residual_state, token_embeddings, params, n_heads=H)

    # float32 MXU path (exact softmax divide).
    out_f32 = readout_attention(residual_state, token_embeddings, params,
                                n_heads=H, compute_dtype=jnp.float32)
    out_f32 = jax.block_until_ready(out_f32)
    assert out_f32.shape == (B, LK, D), out_f32.shape
    assert jnp.allclose(out_f32, ref, atol=1e-2, rtol=1e-2), "f32 mismatch vs reference"

    # Default bfloat16 MXU path (f32 accumulation), looser tolerance.
    out_bf16 = readout_attention(residual_state, token_embeddings, params, n_heads=H)
    out_bf16 = jax.block_until_ready(out_bf16)
    assert out_bf16.shape == (B, LK, D), out_bf16.shape
    assert jnp.allclose(out_bf16, ref, atol=5e-2, rtol=5e-2), "bf16 mismatch vs reference"

    # Exercise the seq_len < fixed_kv_len branch (queries trimmed before the kernel).
    tok_short = token_embeddings[:, :6, :]
    ref_short = _reference(residual_state, tok_short, params, n_heads=H)
    out_short = jax.block_until_ready(
        readout_attention(residual_state, tok_short, params, n_heads=H))
    assert out_short.shape == ref_short.shape, out_short.shape
    assert jnp.allclose(out_short, ref_short, atol=5e-2, rtol=5e-2), "short-seq mismatch"

    print("KERNEL_OK")
</pallas_src>

<mosaic_0001>
module attributes {stable_mosaic.version = 11 : i64} {
  func.func @_readout_attn_kernel(%arg0: i32, %arg1: memref<2x8x128xf32, #tpu.memory_space<vmem>>, %arg2: memref<2x12x128xf32, #tpu.memory_space<vmem>>, %arg3: memref<128x128xf32, #tpu.memory_space<vmem>>, %arg4: memref<256x128xf32, #tpu.memory_space<vmem>>, %arg5: memref<128x128xf32, #tpu.memory_space<vmem>>, %arg6: memref<1x128xf32, #tpu.memory_space<vmem>>, %arg7: memref<2x8x128xf32, #tpu.memory_space<vmem>>, %arg8: memref<2x8x128xf32, #tpu.memory_space<vmem>>, %arg9: memref<2x12x256xf32, #tpu.memory_space<vmem>>, %arg10: memref<16x128xf32, #tpu.memory_space<vmem>>) attributes {dimension_semantics = [#tpu.dimension_semantics<parallel>], iteration_bounds = array<i64: 1>, scalar_prefetch = 0 : i64, scratch_operands = 3 : i64, tpu.core_type = #tpu.core_type<tc>, window_params = [{transform_indices = @transform_0, window_bounds = array<i64: 2, 8, 128>}, {transform_indices = @transform_1, window_bounds = array<i64: 2, 12, 128>}, {pipeline_mode = #tpu.pipeline_mode<synchronous>, transform_indices = @transform_2, window_bounds = array<i64: 128, 128>}, {pipeline_mode = #tpu.pipeline_mode<synchronous>, transform_indices = @transform_3, window_bounds = array<i64: 256, 128>}, {pipeline_mode = #tpu.pipeline_mode<synchronous>, transform_indices = @transform_4, window_bounds = array<i64: 128, 128>}, {pipeline_mode = #tpu.pipeline_mode<synchronous>, transform_indices = @transform_5, window_bounds = array<i64: 1, 128>}, {transform_indices = @transform_6, window_bounds = array<i64: 2, 8, 128>}]} {
    %c0 = arith.constant 0 : index
    %c0_0 = arith.constant 0 : index
    %c0_1 = arith.constant 0 : index
    %0 = vector.load %arg1[%c0, %c0_0, %c0_1] : memref<2x8x128xf32, #tpu.memory_space<vmem>>, vector<2x8x128xf32>
    %1 = vector.shape_cast %0 : vector<2x8x128xf32> to vector<16x128xf32>
    %c0_2 = arith.constant 0 : index
    %c0_3 = arith.constant 0 : index
    %c0_4 = arith.constant 0 : index
    %2 = vector.load %arg2[%c0_2, %c0_3, %c0_4] : memref<2x12x128xf32, #tpu.memory_space<vmem>>, vector<2x12x128xf32>
    %3 = vector.shape_cast %2 : vector<2x12x128xf32> to vector<24x128xf32>
    %c0_5 = arith.constant 0 : index
    %c0_6 = arith.constant 0 : index
    %4 = vector.load %arg3[%c0_5, %c0_6] : memref<128x128xf32, #tpu.memory_space<vmem>>, vector<128x128xf32>
    %cst = arith.constant dense<0.000000e+00> : vector<16x128xf32>
    %5 = tpu.matmul %1, %4, %cst {dimension_numbers = #tpu.dot_dimension_numbers<[1], [1], [0], [0], [0, 0, 1, 0], [], []>} : vector<16x128xf32>, vector<128x128xf32>, vector<16x128xf32> -> vector<16x128xf32>
    %6 = vector.shape_cast %5 : vector<16x128xf32> to vector<2x8x128xf32>
    %c0_7 = arith.constant 0 : index
    %c0_8 = arith.constant 0 : index
    %c0_9 = arith.constant 0 : index
    %7 = vector.load %arg8[%c0_7, %c0_8, %c0_9] : memref<2x8x128xf32, #tpu.memory_space<vmem>>, vector<2x8x128xf32>
    tpu.vector_store %arg8[%c0_7, %c0_8, %c0_9], %6 {strides = array<i32>} : memref<2x8x128xf32, #tpu.memory_space<vmem>>, vector<2x8x128xf32>,
    %c0_10 = arith.constant 0 : index
    %c0_11 = arith.constant 0 : index
    %8 = vector.load %arg4[%c0_10, %c0_11] : memref<256x128xf32, #tpu.memory_space<vmem>>, vector<256x128xf32>
    %cst_12 = arith.constant dense<0.000000e+00> : vector<24x256xf32>
    %9 = tpu.matmul %3, %8, %cst_12 {dimension_numbers = #tpu.dot_dimension_numbers<[1], [1], [0], [0], [0, 0, 1, 0], [], []>} : vector<24x128xf32>, vector<256x128xf32>, vector<24x256xf32> -> vector<24x256xf32>
    %10 = vector.shape_cast %9 : vector<24x256xf32> to vector<2x12x256xf32>
    %c0_13 = arith.constant 0 : index
    %c0_14 = arith.constant 0 : index
    %c0_15 = arith.constant 0 : index
    %11 = vector.load %arg9[%c0_13, %c0_14, %c0_15] : memref<2x12x256xf32, #tpu.memory_space<vmem>>, vector<2x12x256xf32>
    tpu.vector_store %arg9[%c0_13, %c0_14, %c0_15], %10 {strides = array<i32>} : memref<2x12x256xf32, #tpu.memory_space<vmem>>, vector<2x12x256xf32>,
    %c0_16 = arith.constant 0 : index
    %c0_17 = arith.constant 0 : index
    %c0_18 = arith.constant 0 : index
    %12 = vector.load %arg8[%c0_16, %c0_17, %c0_18] : memref<2x8x128xf32, #tpu.memory_space<vmem>>, vector<2x8x32xf32>
    %c0_19 = arith.constant 0 : index
    %c0_20 = arith.constant 0 : index
    %c0_21 = arith.constant 0 : index
    %13 = vector.load %arg9[%c0_19, %c0_20, %c0_21] : memref<2x12x256xf32, #tpu.memory_space<vmem>>, vector<2x12x32xf32>
    %c0_22 = arith.constant 0 : index
    %c0_23 = arith.constant 0 : index
    %c128 = arith.constant 128 : index
    %14 = vector.load %arg9[%c0_22, %c0_23, %c128] : memref<2x12x256xf32, #tpu.memory_space<vmem>>, vector<2x12x32xf32>
    "tpu.trace_start"() <{level = 10 : i32, message = "bqd,bkd->bqk"}> : () -> ()
    %cst_24 = arith.constant dense<0.000000e+00> : vector<2x8x12xf32>
    %15 = tpu.matmul %12, %13, %cst_24 {dimension_numbers = #tpu.dot_dimension_numbers<[2], [2], [1], [1], [0, 0, 0, 1, 1, 1], [0], [0]>} : vector<2x8x32xf32>, vector<2x12x32xf32>, vector<2x8x12xf32> -> vector<2x8x12xf32>
    "tpu.trace_stop"() : () -> ()
    %cst_25 = arith.constant dense<0xFF800000> : vector<2x8xf32>
    %16 = vector.multi_reduction <maximumf>, %15, %cst_25 [2] : vector<2x8x12xf32> to vector<2x8xf32>
    %17 = vector.shape_cast %16 : vector<2x8xf32> to vector<2x8x1xf32>
    %18 = vector.broadcast %17 : vector<2x8x1xf32> to vector<2x8x12xf32>
    %19 = arith.subf %15, %18 : vector<2x8x12xf32>
    %20 = math.exp %19 : vector<2x8x12xf32>
    %cst_26 = arith.constant dense<0.000000e+00> : vector<2x8xf32>
    %21 = vector.multi_reduction <add>, %20, %cst_26 [2] : vector<2x8x12xf32> to vector<2x8xf32>
    %22 = vector.shape_cast %21 : vector<2x8xf32> to vector<2x8x1xf32>
    %23 = vector.broadcast %22 : vector<2x8x1xf32> to vector<2x8x12xf32>
    %24 = arith.divf %20, %23 : vector<2x8x12xf32>
    "tpu.trace_start"() <{level = 10 : i32, message = "bqk,bkd->bqd"}> : () -> ()
    %cst_27 = arith.constant dense<0.000000e+00> : vector<2x8x32xf32>
    %25 = tpu.matmul %24, %14, %cst_27 {dimension_numbers = #tpu.dot_dimension_numbers<[2], [1], [1], [2], [0, 0, 0, 1, 1, 2], [0], [0]>} : vector<2x8x12xf32>, vector<2x12x32xf32>, vector<2x8x32xf32> -> vector<2x8x32xf32>
    "tpu.trace_stop"() : () -> ()
    %26 = vector.shape_cast %25 : vector<2x8x32xf32> to vector<16x32xf32>
    %c0_28 = arith.constant 0 : index
    %c0_29 = arith.constant 0 : index
    %27 = vector.load %arg10[%c0_28, %c0_29] : memref<16x128xf32, #tpu.memory_space<vmem>>, vector<16x32xf32>
    tpu.vector_store %arg10[%c0_28, %c0_29], %26 {strides = array<i32>} : memref<16x128xf32, #tpu.memory_space<vmem>>, vector<16x32xf32>,
    %c0_30 = arith.constant 0 : index
    %c0_31 = arith.constant 0 : index
    %c32 = arith.constant 32 : index
    %28 = vector.load %arg8[%c0_30, %c0_31, %c32] : memref<2x8x128xf32, #tpu.memory_space<vmem>>, vector<2x8x32xf32>
    %c0_32 = arith.constant 0 : index
    %c0_33 = arith.constant 0 : index
    %c32_34 = arith.constant 32 : index
    %29 = vector.load %arg9[%c0_32, %c0_33, %c32_34] : memref<2x12x256xf32, #tpu.memory_space<vmem>>, vector<2x12x32xf32>
    %c0_35 = arith.constant 0 : index
    %c0_36 = arith.constant 0 : index
    %c160 = arith.constant 160 : index
    %30 = vector.load %arg9[%c0_35, %c0_36, %c160] : memref<2x12x256xf32, #tpu.memory_space<vmem>>, vector<2x12x32xf32>
    "tpu.trace_start"() <{level = 10 : i32, message = "bqd,bkd->bqk"}> : () -> ()
    %cst_37 = arith.constant dense<0.000000e+00> : vector<2x8x12xf32>
    %31 = tpu.matmul %28, %29, %cst_37 {dimension_numbers = #tpu.dot_dimension_numbers<[2], [2], [1], [1], [0, 0, 0, 1, 1, 1], [0], [0]>} : vector<2x8x32xf32>, vector<2x12x32xf32>, vector<2x8x12xf32> -> vector<2x8x12xf32>
    "tpu.trace_stop"() : () -> ()
    %cst_38 = arith.constant dense<0xFF800000> : vector<2x8xf32>
    %32 = vector.multi_reduction <maximumf>, %31, %cst_38 [2] : vector<2x8x12xf32> to vector<2x8xf32>
    %33 = vector.shape_cast %32 : vector<2x8xf32> to vector<2x8x1xf32>
    %34 = vector.broadcast %33 : vector<2x8x1xf32> to vector<2x8x12xf32>
    %35 = arith.subf %31, %34 : vector<2x8x12xf32>
    %36 = math.exp %35 : vector<2x8x12xf32>
    %cst_39 = arith.constant dense<0.000000e+00> : vector<2x8xf32>
    %37 = vector.multi_reduction <add>, %36, %cst_39 [2] : vector<2x8x12xf32> to vector<2x8xf32>
    %38 = vector.shape_cast %37 : vector<2x8xf32> to vector<2x8x1xf32>
    %39 = vector.broadcast %38 : vector<2x8x1xf32> to vector<2x8x12xf32>
    %40 = arith.divf %36, %39 : vector<2x8x12xf32>
    "tpu.trace_start"() <{level = 10 : i32, message = "bqk,bkd->bqd"}> : () -> ()
    %cst_40 = arith.constant dense<0.000000e+00> : vector<2x8x32xf32>
    %41 = tpu.matmul %40, %30, %cst_40 {dimension_numbers = #tpu.dot_dimension_numbers<[2], [1], [1], [2], [0, 0, 0, 1, 1, 2], [0], [0]>} : vector<2x8x12xf32>, vector<2x12x32xf32>, vector<2x8x32xf32> -> vector<2x8x32xf32>
    "tpu.trace_stop"() : () -> ()
    %42 = vector.shape_cast %41 : vector<2x8x32xf32> to vector<16x32xf32>
    %c0_41 = arith.constant 0 : index
    %c32_42 = arith.constant 32 : index
    %43 = vector.load %arg10[%c0_41, %c32_42] : memref<16x128xf32, #tpu.memory_space<vmem>>, vector<16x32xf32>
    tpu.vector_store %arg10[%c0_41, %c32_42], %42 {strides = array<i32>} : memref<16x128xf32, #tpu.memory_space<vmem>>, vector<16x32xf32>,
    %c0_43 = arith.constant 0 : index
    %c0_44 = arith.constant 0 : index
    %c64 = arith.constant 64 : index
    %44 = vector.load %arg8[%c0_43, %c0_44, %c64] : memref<2x8x128xf32, #tpu.memory_space<vmem>>, vector<2x8x32xf32>
    %c0_45 = arith.constant 0 : index
    %c0_46 = arith.constant 0 : index
    %c64_47 = arith.constant 64 : index
    %45 = vector.load %arg9[%c0_45, %c0_46, %c64_47] : memref<2x12x256xf32, #tpu.memory_space<vmem>>, vector<2x12x32xf32>
    %c0_48 = arith.constant 0 : index
    %c0_49 = arith.constant 0 : index
    %c192 = arith.constant 192 : index
    %46 = vector.load %arg9[%c0_48, %c0_49, %c192] : memref<2x12x256xf32, #tpu.memory_space<vmem>>, vector<2x12x32xf32>
    "tpu.trace_start"() <{level = 10 : i32, message = "bqd,bkd->bqk"}> : () -> ()
    %cst_50 = arith.constant dense<0.000000e+00> : vector<2x8x12xf32>
    %47 = tpu.matmul %44, %45, %cst_50 {dimension_numbers = #tpu.dot_dimension_numbers<[2], [2], [1], [1], [0, 0, 0, 1, 1, 1], [0], [0]>} : vector<2x8x32xf32>, vector<2x12x32xf32>, vector<2x8x12xf32> -> vector<2x8x12xf32>
    "tpu.trace_stop"() : () -> ()
    %cst_51 = arith.constant dense<0xFF800000> : vector<2x8xf32>
    %48 = vector.multi_reduction <maximumf>, %47, %cst_51 [2] : vector<2x8x12xf32> to vector<2x8xf32>
    %49 = vector.shape_cast %48 : vector<2x8xf32> to vector<2x8x1xf32>
    %50 = vector.broadcast %49 : vector<2x8x1xf32> to vector<2x8x12xf32>
    %51 = arith.subf %47, %50 : vector<2x8x12xf32>
    %52 = math.exp %51 : vector<2x8x12xf32>
    %cst_52 = arith.constant dense<0.000000e+00> : vector<2x8xf32>
    %53 = vector.multi_reduction <add>, %52, %cst_52 [2] : vector<2x8x12xf32> to vector<2x8xf32>
    %54 = vector.shape_cast %53 : vector<2x8xf32> to vector<2x8x1xf32>
    %55 = vector.broadcast %54 : vector<2x8x1xf32> to vector<2x8x12xf32>
    %56 = arith.divf %52, %55 : vector<2x8x12xf32>
    "tpu.trace_start"() <{level = 10 : i32, message = "bqk,bkd->bqd"}> : () -> ()
    %cst_53 = arith.constant dense<0.000000e+00> : vector<2x8x32xf32>
    %57 = tpu.matmul %56, %46, %cst_53 {dimension_numbers = #tpu.dot_dimension_numbers<[2], [1], [1], [2], [0, 0, 0, 1, 1, 2], [0], [0]>} : vector<2x8x12xf32>, vector<2x12x32xf32>, vector<2x8x32xf32> -> vector<2x8x32xf32>
    "tpu.trace_stop"() : () -> ()
    %58 = vector.shape_cast %57 : vector<2x8x32xf32> to vector<16x32xf32>
    %c0_54 = arith.constant 0 : index
    %c64_55 = arith.constant 64 : index
    %59 = vector.load %arg10[%c0_54, %c64_55] : memref<16x128xf32, #tpu.memory_space<vmem>>, vector<16x32xf32>
    tpu.vector_store %arg10[%c0_54, %c64_55], %58 {strides = array<i32>} : memref<16x128xf32, #tpu.memory_space<vmem>>, vector<16x32xf32>,
    %c0_56 = arith.constant 0 : index
    %c0_57 = arith.constant 0 : index
    %c96 = arith.constant 96 : index
    %60 = vector.load %arg8[%c0_56, %c0_57, %c96] : memref<2x8x128xf32, #tpu.memory_space<vmem>>, vector<2x8x32xf32>
    %c0_58 = arith.constant 0 : index
    %c0_59 = arith.constant 0 : index
    %c96_60 = arith.constant 96 : index
    %61 = vector.load %arg9[%c0_58, %c0_59, %c96_60] : memref<2x12x256xf32, #tpu.memory_space<vmem>>, vector<2x12x32xf32>
    %c0_61 = arith.constant 0 : index
    %c0_62 = arith.constant 0 : index
    %c224 = arith.constant 224 : index
    %62 = vector.load %arg9[%c0_61, %c0_62, %c224] : memref<2x12x256xf32, #tpu.memory_space<vmem>>, vector<2x12x32xf32>
    "tpu.trace_start"() <{level = 10 : i32, message = "bqd,bkd->bqk"}> : () -> ()
    %cst_63 = arith.constant dense<0.000000e+00> : vector<2x8x12xf32>
    %63 = tpu.matmul %60, %61, %cst_63 {dimension_numbers = #tpu.dot_dimension_numbers<[2], [2], [1], [1], [0, 0, 0, 1, 1, 1], [0], [0]>} : vector<2x8x32xf32>, vector<2x12x32xf32>, vector<2x8x12xf32> -> vector<2x8x12xf32>
    "tpu.trace_stop"() : () -> ()
    %cst_64 = arith.constant dense<0xFF800000> : vector<2x8xf32>
    %64 = vector.multi_reduction <maximumf>, %63, %cst_64 [2] : vector<2x8x12xf32> to vector<2x8xf32>
    %65 = vector.shape_cast %64 : vector<2x8xf32> to vector<2x8x1xf32>
    %66 = vector.broadcast %65 : vector<2x8x1xf32> to vector<2x8x12xf32>
    %67 = arith.subf %63, %66 : vector<2x8x12xf32>
    %68 = math.exp %67 : vector<2x8x12xf32>
    %cst_65 = arith.constant dense<0.000000e+00> : vector<2x8xf32>
    %69 = vector.multi_reduction <add>, %68, %cst_65 [2] : vector<2x8x12xf32> to vector<2x8xf32>
    %70 = vector.shape_cast %69 : vector<2x8xf32> to vector<2x8x1xf32>
    %71 = vector.broadcast %70 : vector<2x8x1xf32> to vector<2x8x12xf32>
    %72 = arith.divf %68, %71 : vector<2x8x12xf32>
    "tpu.trace_start"() <{level = 10 : i32, message = "bqk,bkd->bqd"}> : () -> ()
    %cst_66 = arith.constant dense<0.000000e+00> : vector<2x8x32xf32>
    %73 = tpu.matmul %72, %62, %cst_66 {dimension_numbers = #tpu.dot_dimension_numbers<[2], [1], [1], [2], [0, 0, 0, 1, 1, 2], [0], [0]>} : vector<2x8x12xf32>, vector<2x12x32xf32>, vector<2x8x32xf32> -> vector<2x8x32xf32>
    "tpu.trace_stop"() : () -> ()
    %74 = vector.shape_cast %73 : vector<2x8x32xf32> to vector<16x32xf32>
    %c0_67 = arith.constant 0 : index
    %c96_68 = arith.constant 96 : index
    %75 = vector.load %arg10[%c0_67, %c96_68] : memref<16x128xf32, #tpu.memory_space<vmem>>, vector<16x32xf32>
    tpu.vector_store %arg10[%c0_67, %c96_68], %74 {strides = array<i32>} : memref<16x128xf32, #tpu.memory_space<vmem>>, vector<16x32xf32>,
    %c0_69 = arith.constant 0 : index
    %c0_70 = arith.constant 0 : index
    %76 = vector.load %arg10[%c0_69, %c0_70] : memref<16x128xf32, #tpu.memory_space<vmem>>, vector<16x128xf32>
    %c0_71 = arith.constant 0 : index
    %c0_72 = arith.constant 0 : index
    %77 = vector.load %arg5[%c0_71, %c0_72] : memref<128x128xf32, #tpu.memory_space<vmem>>, vector<128x128xf32>
    %cst_73 = arith.constant dense<0.000000e+00> : vector<16x128xf32>
    %78 = tpu.matmul %76, %77, %cst_73 {dimension_numbers = #tpu.dot_dimension_numbers<[1], [1], [0], [0], [0, 0, 1, 0], [], []>} : vector<16x128xf32>, vector<128x128xf32>, vector<16x128xf32> -> vector<16x128xf32>
    %c0_74 = arith.constant 0 : index
    %c0_75 = arith.constant 0 : index
    %79 = vector.load %arg6[%c0_74, %c0_75] : memref<1x128xf32, #tpu.memory_space<vmem>>, vector<1x128xf32>
    %80 = vector.broadcast %79 : vector<1x128xf32> to vector<16x128xf32>
    %81 = arith.addf %78, %80 : vector<16x128xf32>
    %82 = vector.shape_cast %81 : vector<16x128xf32> to vector<2x8x128xf32>
    %c0_76 = arith.constant 0 : index
    %c0_77 = arith.constant 0 : index
    %c0_78 = arith.constant 0 : index
    %83 = vector.load %arg7[%c0_76, %c0_77, %c0_78] : memref<2x8x128xf32, #tpu.memory_space<vmem>>, vector<2x8x128xf32>
    tpu.vector_store %arg7[%c0_76, %c0_77, %c0_78], %82 {strides = array<i32>} : memref<2x8x128xf32, #tpu.memory_space<vmem>>, vector<2x8x128xf32>,
    return
  }
  func.func @transform_0(%arg0: i32) -> (i32, i32, i32) {
    %c0_i32 = arith.constant 0 : i32
    %c0_i32_0 = arith.constant 0 : i32
    %c0_i32_1 = arith.constant 0 : i32
    return %arg0, %c0_i32, %c0_i32_0 : i32, i32, i32
  }
  func.func @transform_1(%arg0: i32) -> (i32, i32, i32) {
    %c0_i32 = arith.constant 0 : i32
    %c0_i32_0 = arith.constant 0 : i32
    %c0_i32_1 = arith.constant 0 : i32
    return %arg0, %c0_i32, %c0_i32_0 : i32, i32, i32
  }
  func.func @transform_2(%arg0: i32) -> (i32, i32) {
    %c0_i32 = arith.constant 0 : i32
    %c0_i32_0 = arith.constant 0 : i32
    %c0_i32_1 = arith.constant 0 : i32
    return %c0_i32, %c0_i32_0 : i32, i32
  }
  func.func @transform_3(%arg0: i32) -> (i32, i32) {
    %c0_i32 = arith.constant 0 : i32
    %c0_i32_0 = arith.constant 0 : i32
    %c0_i32_1 = arith.constant 0 : i32
    return %c0_i32, %c0_i32_0 : i32, i32
  }
  func.func @transform_4(%arg0: i32) -> (i32, i32) {
    %c0_i32 = arith.constant 0 : i32
    %c0_i32_0 = arith.constant 0 : i32
    %c0_i32_1 = arith.constant 0 : i32
    return %c0_i32, %c0_i32_0 : i32, i32
  }
  func.func @transform_5(%arg0: i32) -> (i32, i32) {
    %c0_i32 = arith.constant 0 : i32
    %c0_i32_0 = arith.constant 0 : i32
    %c0_i32_1 = arith.constant 0 : i32
    return %c0_i32, %c0_i32_0 : i32, i32
  }
  func.func @transform_6(%arg0: i32) -> (i32, i32, i32) {
    %c0_i32 = arith.constant 0 : i32
    %c0_i32_0 = arith.constant 0 : i32
    %c0_i32_1 = arith.constant 0 : i32
    return %arg0, %c0_i32, %c0_i32_0 : i32, i32, i32
  }
}

module attributes {stable_mosaic.version = 11 : i64} {
  func.func @_readout_attn_kernel(%arg0: i32, %arg1: memref<2x8x128xf32, #tpu.memory_space<vmem>>, %arg2: memref<2x12x128xf32, #tpu.memory_space<vmem>>, %arg3: memref<128x128xf32, #tpu.memory_space<vmem>>, %arg4: memref<256x128xf32, #tpu.memory_space<vmem>>, %arg5: memref<128x128xf32, #tpu.memory_space<vmem>>, %arg6: memref<1x128xf32, #tpu.memory_space<vmem>>, %arg7: memref<2x8x128xf32, #tpu.memory_space<vmem>>, %arg8: memref<2x8x128xf32, #tpu.memory_space<vmem>>, %arg9: memref<2x12x256xf32, #tpu.memory_space<vmem>>, %arg10: memref<16x128xf32, #tpu.memory_space<vmem>>) attributes {dimension_semantics = [#tpu.dimension_semantics<parallel>], iteration_bounds = array<i64: 1>, scalar_prefetch = 0 : i64, scratch_operands = 3 : i64, tpu.core_type = #tpu.core_type<tc>, window_params = [{transform_indices = @transform_0, window_bounds = array<i64: 2, 8, 128>}, {transform_indices = @transform_1, window_bounds = array<i64: 2, 12, 128>}, {pipeline_mode = #tpu.pipeline_mode<synchronous>, transform_indices = @transform_2, window_bounds = array<i64: 128, 128>}, {pipeline_mode = #tpu.pipeline_mode<synchronous>, transform_indices = @transform_3, window_bounds = array<i64: 256, 128>}, {pipeline_mode = #tpu.pipeline_mode<synchronous>, transform_indices = @transform_4, window_bounds = array<i64: 128, 128>}, {pipeline_mode = #tpu.pipeline_mode<synchronous>, transform_indices = @transform_5, window_bounds = array<i64: 1, 128>}, {transform_indices = @transform_6, window_bounds = array<i64: 2, 8, 128>}]} {
    %c0 = arith.constant 0 : index
    %c0_0 = arith.constant 0 : index
    %c0_1 = arith.constant 0 : index
    %0 = vector.load %arg1[%c0, %c0_0, %c0_1] : memref<2x8x128xf32, #tpu.memory_space<vmem>>, vector<2x8x128xf32>
    %1 = vector.shape_cast %0 : vector<2x8x128xf32> to vector<16x128xf32>
    %c0_2 = arith.constant 0 : index
    %c0_3 = arith.constant 0 : index
    %c0_4 = arith.constant 0 : index
    %2 = vector.load %arg2[%c0_2, %c0_3, %c0_4] : memref<2x12x128xf32, #tpu.memory_space<vmem>>, vector<2x12x128xf32>
    %3 = vector.shape_cast %2 : vector<2x12x128xf32> to vector<24x128xf32>
    %c0_5 = arith.constant 0 : index
    %c0_6 = arith.constant 0 : index
    %4 = vector.load %arg3[%c0_5, %c0_6] : memref<128x128xf32, #tpu.memory_space<vmem>>, vector<128x128xf32>
    %cst = arith.constant dense<0.000000e+00> : vector<16x128xf32>
    %5 = tpu.matmul %1, %4, %cst {dimension_numbers = #tpu.dot_dimension_numbers<[1], [1], [0], [0], [0, 0, 1, 0], [], []>} : vector<16x128xf32>, vector<128x128xf32>, vector<16x128xf32> -> vector<16x128xf32>
    %6 = vector.shape_cast %5 : vector<16x128xf32> to vector<2x8x128xf32>
    %c0_7 = arith.constant 0 : index
    %c0_8 = arith.constant 0 : index
    %c0_9 = arith.constant 0 : index
    %7 = vector.load %arg8[%c0_7, %c0_8, %c0_9] : memref<2x8x128xf32, #tpu.memory_space<vmem>>, vector<2x8x128xf32>
    tpu.vector_store %arg8[%c0_7, %c0_8, %c0_9], %6 {strides = array<i32>} : memref<2x8x128xf32, #tpu.memory_space<vmem>>, vector<2x8x128xf32>,
    %c0_10 = arith.constant 0 : index
    %c0_11 = arith.constant 0 : index
    %8 = vector.load %arg4[%c0_10, %c0_11] : memref<256x128xf32, #tpu.memory_space<vmem>>, vector<256x128xf32>
    %cst_12 = arith.constant dense<0.000000e+00> : vector<24x256xf32>
    %9 = tpu.matmul %3, %8, %cst_12 {dimension_numbers = #tpu.dot_dimension_numbers<[1], [1], [0], [0], [0, 0, 1, 0], [], []>} : vector<24x128xf32>, vector<256x128xf32>, vector<24x256xf32> -> vector<24x256xf32>
    %10 = vector.shape_cast %9 : vector<24x256xf32> to vector<2x12x256xf32>
    %c0_13 = arith.constant 0 : index
    %c0_14 = arith.constant 0 : index
    %c0_15 = arith.constant 0 : index
    %11 = vector.load %arg9[%c0_13, %c0_14, %c0_15] : memref<2x12x256xf32, #tpu.memory_space<vmem>>, vector<2x12x256xf32>
    tpu.vector_store %arg9[%c0_13, %c0_14, %c0_15], %10 {strides = array<i32>} : memref<2x12x256xf32, #tpu.memory_space<vmem>>, vector<2x12x256xf32>,
    %c0_16 = arith.constant 0 : index
    %c0_17 = arith.constant 0 : index
    %c0_18 = arith.constant 0 : index
    %12 = vector.load %arg8[%c0_16, %c0_17, %c0_18] : memref<2x8x128xf32, #tpu.memory_space<vmem>>, vector<2x8x32xf32>
    %c0_19 = arith.constant 0 : index
    %c0_20 = arith.constant 0 : index
    %c0_21 = arith.constant 0 : index
    %13 = vector.load %arg9[%c0_19, %c0_20, %c0_21] : memref<2x12x256xf32, #tpu.memory_space<vmem>>, vector<2x12x32xf32>
    %c0_22 = arith.constant 0 : index
    %c0_23 = arith.constant 0 : index
    %c128 = arith.constant 128 : index
    %14 = vector.load %arg9[%c0_22, %c0_23, %c128] : memref<2x12x256xf32, #tpu.memory_space<vmem>>, vector<2x12x32xf32>
    "tpu.trace_start"() <{level = 10 : i32, message = "bqd,bkd->bqk"}> : () -> ()
    %cst_24 = arith.constant dense<0.000000e+00> : vector<2x8x12xf32>
    %15 = tpu.matmul %12, %13, %cst_24 {dimension_numbers = #tpu.dot_dimension_numbers<[2], [2], [1], [1], [0, 0, 0, 1, 1, 1], [0], [0]>} : vector<2x8x32xf32>, vector<2x12x32xf32>, vector<2x8x12xf32> -> vector<2x8x12xf32>
    "tpu.trace_stop"() : () -> ()
    %cst_25 = arith.constant dense<0xFF800000> : vector<2x8xf32>
    %16 = vector.multi_reduction <maximumf>, %15, %cst_25 [2] : vector<2x8x12xf32> to vector<2x8xf32>
    %17 = vector.shape_cast %16 : vector<2x8xf32> to vector<2x8x1xf32>
    %18 = vector.broadcast %17 : vector<2x8x1xf32> to vector<2x8x12xf32>
    %19 = arith.subf %15, %18 : vector<2x8x12xf32>
    %20 = math.exp %19 : vector<2x8x12xf32>
    %cst_26 = arith.constant dense<0.000000e+00> : vector<2x8xf32>
    %21 = vector.multi_reduction <add>, %20, %cst_26 [2] : vector<2x8x12xf32> to vector<2x8xf32>
    %22 = vector.shape_cast %21 : vector<2x8xf32> to vector<2x8x1xf32>
    %23 = vector.broadcast %22 : vector<2x8x1xf32> to vector<2x8x12xf32>
    %24 = arith.divf %20, %23 : vector<2x8x12xf32>
    "tpu.trace_start"() <{level = 10 : i32, message = "bqk,bkd->bqd"}> : () -> ()
    %cst_27 = arith.constant dense<0.000000e+00> : vector<2x8x32xf32>
    %25 = tpu.matmul %24, %14, %cst_27 {dimension_numbers = #tpu.dot_dimension_numbers<[2], [1], [1], [2], [0, 0, 0, 1, 1, 2], [0], [0]>} : vector<2x8x12xf32>, vector<2x12x32xf32>, vector<2x8x32xf32> -> vector<2x8x32xf32>
    "tpu.trace_stop"() : () -> ()
    %26 = vector.shape_cast %25 : vector<2x8x32xf32> to vector<16x32xf32>
    %c0_28 = arith.constant 0 : index
    %c0_29 = arith.constant 0 : index
    %27 = vector.load %arg10[%c0_28, %c0_29] : memref<16x128xf32, #tpu.memory_space<vmem>>, vector<16x32xf32>
    tpu.vector_store %arg10[%c0_28, %c0_29], %26 {strides = array<i32>} : memref<16x128xf32, #tpu.memory_space<vmem>>, vector<16x32xf32>,
    %c0_30 = arith.constant 0 : index
    %c0_31 = arith.constant 0 : index
    %c32 = arith.constant 32 : index
    %28 = vector.load %arg8[%c0_30, %c0_31, %c32] : memref<2x8x128xf32, #tpu.memory_space<vmem>>, vector<2x8x32xf32>
    %c0_32 = arith.constant 0 : index
    %c0_33 = arith.constant 0 : index
    %c32_34 = arith.constant 32 : index
    %29 = vector.load %arg9[%c0_32, %c0_33, %c32_34] : memref<2x12x256xf32, #tpu.memory_space<vmem>>, vector<2x12x32xf32>
    %c0_35 = arith.constant 0 : index
    %c0_36 = arith.constant 0 : index
    %c160 = arith.constant 160 : index
    %30 = vector.load %arg9[%c0_35, %c0_36, %c160] : memref<2x12x256xf32, #tpu.memory_space<vmem>>, vector<2x12x32xf32>
    "tpu.trace_start"() <{level = 10 : i32, message = "bqd,bkd->bqk"}> : () -> ()
    %cst_37 = arith.constant dense<0.000000e+00> : vector<2x8x12xf32>
    %31 = tpu.matmul %28, %29, %cst_37 {dimension_numbers = #tpu.dot_dimension_numbers<[2], [2], [1], [1], [0, 0, 0, 1, 1, 1], [0], [0]>} : vector<2x8x32xf32>, vector<2x12x32xf32>, vector<2x8x12xf32> -> vector<2x8x12xf32>
    "tpu.trace_stop"() : () -> ()
    %cst_38 = arith.constant dense<0xFF800000> : vector<2x8xf32>
    %32 = vector.multi_reduction <maximumf>, %31, %cst_38 [2] : vector<2x8x12xf32> to vector<2x8xf32>
    %33 = vector.shape_cast %32 : vector<2x8xf32> to vector<2x8x1xf32>
    %34 = vector.broadcast %33 : vector<2x8x1xf32> to vector<2x8x12xf32>
    %35 = arith.subf %31, %34 : vector<2x8x12xf32>
    %36 = math.exp %35 : vector<2x8x12xf32>
    %cst_39 = arith.constant dense<0.000000e+00> : vector<2x8xf32>
    %37 = vector.multi_reduction <add>, %36, %cst_39 [2] : vector<2x8x12xf32> to vector<2x8xf32>
    %38 = vector.shape_cast %37 : vector<2x8xf32> to vector<2x8x1xf32>
    %39 = vector.broadcast %38 : vector<2x8x1xf32> to vector<2x8x12xf32>
    %40 = arith.divf %36, %39 : vector<2x8x12xf32>
    "tpu.trace_start"() <{level = 10 : i32, message = "bqk,bkd->bqd"}> : () -> ()
    %cst_40 = arith.constant dense<0.000000e+00> : vector<2x8x32xf32>
    %41 = tpu.matmul %40, %30, %cst_40 {dimension_numbers = #tpu.dot_dimension_numbers<[2], [1], [1], [2], [0, 0, 0, 1, 1, 2], [0], [0]>} : vector<2x8x12xf32>, vector<2x12x32xf32>, vector<2x8x32xf32> -> vector<2x8x32xf32>
    "tpu.trace_stop"() : () -> ()
    %42 = vector.shape_cast %41 : vector<2x8x32xf32> to vector<16x32xf32>
    %c0_41 = arith.constant 0 : index
    %c32_42 = arith.constant 32 : index
    %43 = vector.load %arg10[%c0_41, %c32_42] : memref<16x128xf32, #tpu.memory_space<vmem>>, vector<16x32xf32>
    tpu.vector_store %arg10[%c0_41, %c32_42], %42 {strides = array<i32>} : memref<16x128xf32, #tpu.memory_space<vmem>>, vector<16x32xf32>,
    %c0_43 = arith.constant 0 : index
    %c0_44 = arith.constant 0 : index
    %c64 = arith.constant 64 : index
    %44 = vector.load %arg8[%c0_43, %c0_44, %c64] : memref<2x8x128xf32, #tpu.memory_space<vmem>>, vector<2x8x32xf32>
    %c0_45 = arith.constant 0 : index
    %c0_46 = arith.constant 0 : index
    %c64_47 = arith.constant 64 : index
    %45 = vector.load %arg9[%c0_45, %c0_46, %c64_47] : memref<2x12x256xf32, #tpu.memory_space<vmem>>, vector<2x12x32xf32>
    %c0_48 = arith.constant 0 : index
    %c0_49 = arith.constant 0 : index
    %c192 = arith.constant 192 : index
    %46 = vector.load %arg9[%c0_48, %c0_49, %c192] : memref<2x12x256xf32, #tpu.memory_space<vmem>>, vector<2x12x32xf32>
    "tpu.trace_start"() <{level = 10 : i32, message = "bqd,bkd->bqk"}> : () -> ()
    %cst_50 = arith.constant dense<0.000000e+00> : vector<2x8x12xf32>
    %47 = tpu.matmul %44, %45, %cst_50 {dimension_numbers = #tpu.dot_dimension_numbers<[2], [2], [1], [1], [0, 0, 0, 1, 1, 1], [0], [0]>} : vector<2x8x32xf32>, vector<2x12x32xf32>, vector<2x8x12xf32> -> vector<2x8x12xf32>
    "tpu.trace_stop"() : () -> ()
    %cst_51 = arith.constant dense<0xFF800000> : vector<2x8xf32>
    %48 = vector.multi_reduction <maximumf>, %47, %cst_51 [2] : vector<2x8x12xf32> to vector<2x8xf32>
    %49 = vector.shape_cast %48 : vector<2x8xf32> to vector<2x8x1xf32>
    %50 = vector.broadcast %49 : vector<2x8x1xf32> to vector<2x8x12xf32>
    %51 = arith.subf %47, %50 : vector<2x8x12xf32>
    %52 = math.exp %51 : vector<2x8x12xf32>
    %cst_52 = arith.constant dense<0.000000e+00> : vector<2x8xf32>
    %53 = vector.multi_reduction <add>, %52, %cst_52 [2] : vector<2x8x12xf32> to vector<2x8xf32>
    %54 = vector.shape_cast %53 : vector<2x8xf32> to vector<2x8x1xf32>
    %55 = vector.broadcast %54 : vector<2x8x1xf32> to vector<2x8x12xf32>
    %56 = arith.divf %52, %55 : vector<2x8x12xf32>
    "tpu.trace_start"() <{level = 10 : i32, message = "bqk,bkd->bqd"}> : () -> ()
    %cst_53 = arith.constant dense<0.000000e+00> : vector<2x8x32xf32>
    %57 = tpu.matmul %56, %46, %cst_53 {dimension_numbers = #tpu.dot_dimension_numbers<[2], [1], [1], [2], [0, 0, 0, 1, 1, 2], [0], [0]>} : vector<2x8x12xf32>, vector<2x12x32xf32>, vector<2x8x32xf32> -> vector<2x8x32xf32>
    "tpu.trace_stop"() : () -> ()
    %58 = vector.shape_cast %57 : vector<2x8x32xf32> to vector<16x32xf32>
    %c0_54 = arith.constant 0 : index
    %c64_55 = arith.constant 64 : index
    %59 = vector.load %arg10[%c0_54, %c64_55] : memref<16x128xf32, #tpu.memory_space<vmem>>, vector<16x32xf32>
    tpu.vector_store %arg10[%c0_54, %c64_55], %58 {strides = array<i32>} : memref<16x128xf32, #tpu.memory_space<vmem>>, vector<16x32xf32>,
    %c0_56 = arith.constant 0 : index
    %c0_57 = arith.constant 0 : index
    %c96 = arith.constant 96 : index
    %60 = vector.load %arg8[%c0_56, %c0_57, %c96] : memref<2x8x128xf32, #tpu.memory_space<vmem>>, vector<2x8x32xf32>
    %c0_58 = arith.constant 0 : index
    %c0_59 = arith.constant 0 : index
    %c96_60 = arith.constant 96 : index
    %61 = vector.load %arg9[%c0_58, %c0_59, %c96_60] : memref<2x12x256xf32, #tpu.memory_space<vmem>>, vector<2x12x32xf32>
    %c0_61 = arith.constant 0 : index
    %c0_62 = arith.constant 0 : index
    %c224 = arith.constant 224 : index
    %62 = vector.load %arg9[%c0_61, %c0_62, %c224] : memref<2x12x256xf32, #tpu.memory_space<vmem>>, vector<2x12x32xf32>
    "tpu.trace_start"() <{level = 10 : i32, message = "bqd,bkd->bqk"}> : () -> ()
    %cst_63 = arith.constant dense<0.000000e+00> : vector<2x8x12xf32>
    %63 = tpu.matmul %60, %61, %cst_63 {dimension_numbers = #tpu.dot_dimension_numbers<[2], [2], [1], [1], [0, 0, 0, 1, 1, 1], [0], [0]>} : vector<2x8x32xf32>, vector<2x12x32xf32>, vector<2x8x12xf32> -> vector<2x8x12xf32>
    "tpu.trace_stop"() : () -> ()
    %cst_64 = arith.constant dense<0xFF800000> : vector<2x8xf32>
    %64 = vector.multi_reduction <maximumf>, %63, %cst_64 [2] : vector<2x8x12xf32> to vector<2x8xf32>
    %65 = vector.shape_cast %64 : vector<2x8xf32> to vector<2x8x1xf32>
    %66 = vector.broadcast %65 : vector<2x8x1xf32> to vector<2x8x12xf32>
    %67 = arith.subf %63, %66 : vector<2x8x12xf32>
    %68 = math.exp %67 : vector<2x8x12xf32>
    %cst_65 = arith.constant dense<0.000000e+00> : vector<2x8xf32>
    %69 = vector.multi_reduction <add>, %68, %cst_65 [2] : vector<2x8x12xf32> to vector<2x8xf32>
    %70 = vector.shape_cast %69 : vector<2x8xf32> to vector<2x8x1xf32>
    %71 = vector.broadcast %70 : vector<2x8x1xf32> to vector<2x8x12xf32>
    %72 = arith.divf %68, %71 : vector<2x8x12xf32>
    "tpu.trace_start"() <{level = 10 : i32, message = "bqk,bkd->bqd"}> : () -> ()
    %cst_66 = arith.constant dense<0.000000e+00> : vector<2x8x32xf32>
    %73 = tpu.matmul %72, %62, %cst_66 {dimension_numbers = #tpu.dot_dimension_numbers<[2], [1], [1], [2], [0, 0, 0, 1, 1, 2], [0], [0]>} : vector<2x8x12xf32>, vector<2x12x32xf32>, vector<2x8x32xf32> -> vector<2x8x32xf32>
    "tpu.trace_stop"() : () -> ()
    %74 = vector.shape_cast %73 : vector<2x8x32xf32> to vector<16x32xf32>
    %c0_67 = arith.constant 0 : index
    %c96_68 = arith.constant 96 : index
    %75 = vector.load %arg10[%c0_67, %c96_68] : memref<16x128xf32, #tpu.memory_space<vmem>>, vector<16x32xf32>
    tpu.vector_store %arg10[%c0_67, %c96_68], %74 {strides = array<i32>} : memref<16x128xf32, #tpu.memory_space<vmem>>, vector<16x32xf32>,
    %c0_69 = arith.constant 0 : index
    %c0_70 = arith.constant 0 : index
    %76 = vector.load %arg10[%c0_69, %c0_70] : memref<16x128xf32, #tpu.memory_space<vmem>>, vector<16x128xf32>
    %c0_71 = arith.constant 0 : index
    %c0_72 = arith.constant 0 : index
    %77 = vector.load %arg5[%c0_71, %c0_72] : memref<128x128xf32, #tpu.memory_space<vmem>>, vector<128x128xf32>
    %cst_73 = arith.constant dense<0.000000e+00> : vector<16x128xf32>
    %78 = tpu.matmul %76, %77, %cst_73 {dimension_numbers = #tpu.dot_dimension_numbers<[1], [1], [0], [0], [0, 0, 1, 0], [], []>} : vector<16x128xf32>, vector<128x128xf32>, vector<16x128xf32> -> vector<16x128xf32>
    %c0_74 = arith.constant 0 : index
    %c0_75 = arith.constant 0 : index
    %79 = vector.load %arg6[%c0_74, %c0_75] : memref<1x128xf32, #tpu.memory_space<vmem>>, vector<1x128xf32>
    %80 = vector.broadcast %79 : vector<1x128xf32> to vector<16x128xf32>
    %81 = arith.addf %78, %80 : vector<16x128xf32>
    %82 = vector.shape_cast %81 : vector<16x128xf32> to vector<2x8x128xf32>
    %c0_76 = arith.constant 0 : index
    %c0_77 = arith.constant 0 : index
    %c0_78 = arith.constant 0 : index
    %83 = vector.load %arg7[%c0_76, %c0_77, %c0_78] : memref<2x8x128xf32, #tpu.memory_space<vmem>>, vector<2x8x128xf32>
    tpu.vector_store %arg7[%c0_76, %c0_77, %c0_78], %82 {strides = array<i32>} : memref<2x8x128xf32, #tpu.memory_space<vmem>>, vector<2x8x128xf32>,
    return
  }
  func.func @transform_0(%arg0: i32) -> (i32, i32, i32) {
    %c0_i32 = arith.constant 0 : i32
    %c0_i32_0 = arith.constant 0 : i32
    %c0_i32_1 = arith.constant 0 : i32
    return %arg0, %c0_i32, %c0_i32_0 : i32, i32, i32
  }
  func.func @transform_1(%arg0: i32) -> (i32, i32, i32) {
    %c0_i32 = arith.constant 0 : i32
    %c0_i32_0 = arith.constant 0 : i32
    %c0_i32_1 = arith.constant 0 : i32
    return %arg0, %c0_i32, %c0_i32_0 : i32, i32, i32
  }
  func.func @transform_2(%arg0: i32) -> (i32, i32) {
    %c0_i32 = arith.constant 0 : i32
    %c0_i32_0 = arith.constant 0 : i32
    %c0_i32_1 = arith.constant 0 : i32
    return %c0_i32, %c0_i32_0 : i32, i32
  }
  func.func @transform_3(%arg0: i32) -> (i32, i32) {
    %c0_i32 = arith.constant 0 : i32
    %c0_i32_0 = arith.constant 0 : i32
    %c0_i32_1 = arith.constant 0 : i32
    return %c0_i32, %c0_i32_0 : i32, i32
  }
  func.func @transform_4(%arg0: i32) -> (i32, i32) {
    %c0_i32 = arith.constant 0 : i32
    %c0_i32_0 = arith.constant 0 : i32
    %c0_i32_1 = arith.constant 0 : i32
    return %c0_i32, %c0_i32_0 : i32, i32
  }
  func.func @transform_5(%arg0: i32) -> (i32, i32) {
    %c0_i32 = arith.constant 0 : i32
    %c0_i32_0 = arith.constant 0 : i32
    %c0_i32_1 = arith.constant 0 : i32
    return %c0_i32, %c0_i32_0 : i32, i32
  }
  func.func @transform_6(%arg0: i32) -> (i32, i32, i32) {
    %c0_i32 = arith.constant 0 : i32
    %c0_i32_0 = arith.constant 0 : i32
    %c0_i32_1 = arith.constant 0 : i32
    return %arg0, %c0_i32, %c0_i32_0 : i32, i32, i32
  }
}

</mosaic_0001>

<bundles_post_ra>
// kernel: tpu_custom_call.1
= control target key start
LH: loop header
LB: loop body
LE: loop exit
PB: predicated region body
PF: predicated region fallthrough
CT: control target
= control target key end

     0   :  { %11 = vsyncpa [#allocation6], 0  ;;  %s1589_s0 = inlined_call_operand.vmem [shape: f32[2,8,128], index: 0, kind: input, shape index: {}]   ;;  %s1590_s1 = inlined_call_operand.vmem [shape: f32[2,12,128], index: 1, kind: input, shape index: {}]   ;;  %s1591_s2 = inlined_call_operand.hbm [shape: f32[128,128], index: 2, kind: input, shape index: {}]   ;;  %s1592_s3 = inlined_call_operand.hbm [shape: f32[256,128], index: 3, kind: input, shape index: {}]   ;;  %s1593_s4 = inlined_call_operand.hbm [shape: f32[128,128], index: 4, kind: input, shape index: {}]   ;;  %s1594_s5 = inlined_call_operand.vmem [shape: f32[1,128], index: 5, kind: input, shape index: {}]   ;;  %s1595_s6 = inlined_call_operand.hbm [shape: f32[2,8,128], index: 6, kind: output, shape index: {}]  }
   0x1   :  { %12 = vsyncpa [#allocation9], 0 }
   0x2   :  { %13 = vsyncpa [#allocation7], 0  ;;  %s35_s23 = sshll.u32 %s1592_s3, 4  ;;  %s1311_s24 = smov [#allocation8]   ;;  %s36_s23 = int_to_ptr.hbm [resolvable:$true] %s35_s23 }
   0x3   :  { %s37_s25 = sshll.u32 %s1311_s24, 4  ;;  %s22_s28 = sshll.u32 %s1591_s2, 4  ;;  %s38_s25 = int_to_ptr.vmem [resolvable:$true] %s37_s25  ;;  %s23_s28 = int_to_ptr.hbm [resolvable:$true] %s22_s28 }
   0x4   :  { %s1312_s29 = smov 128   ;;  %s1313_s30 = smov 8  }
   0x5   :  { %43 = dma.hbm_to_vmem [thread:$0]  %s36_s23, 4096, %s38_s25, [#allocation9], %s1312_s29, %s1312_s29, %s1313_s30  }
   0x6   :  { %s1314_s7 = smov [#allocation5]   ;;  %s48_s3 = sshll.u32 %s1593_s4, 4  ;;  %s49_s3 = int_to_ptr.hbm [resolvable:$true] %s48_s3 }
   0x7   :  { %s24_s8 = sshll.u32 %s1314_s7, 4  ;;  %s1315_s2 = smov [#allocation10]   ;;  %s25_s8 = int_to_ptr.vmem [resolvable:$true] %s24_s8 }
   0x8   :  { %30 = dma.hbm_to_vmem [thread:$0]  %s23_s28, 2048, %s25_s8, [#allocation6], %s1312_s29, %s1312_s29, %s1313_s30  }
   0x9   :  { %s50_s11 = sshll.u32 %s1315_s2, 4  ;;  %s51_s11 = int_to_ptr.vmem [resolvable:$true] %s50_s11 }
   0xa   :  { %56 = dma.hbm_to_vmem [thread:$0]  %s49_s3, 2048, %s51_s11, [#allocation9], %s1312_s29, %s1312_s29, %s1313_s30  }
   0xb   :  { %1305 = dma.done.wait [#allocation6], 2048  }
   0xc   :  { %1306 = vsyncadd [#allocation6], 4294965248 }
   0xd   :  { %1307 = dma.done.wait [#allocation9], 6144  }
   0xe   :  { %1308 = vsyncadd [#allocation9], 4294961152  ;;  %v155_v0 = vld [vmem:[#allocation8 + $0xf8] sm:$0xff]  ;;  %v154_v2 = vld [vmem:[#allocation8 + $0xf0] sm:$0xff]  ;;  %vm234_vm0 = vcmask 1043456   ;;  %vm289_vm1 = vcmask 261120  }
   0xf   :  { %v139_v1 = vld [vmem:[#allocation8 + $0x78] sm:$0xff]  ;;  %199 = vmatpush.xpose.msra.mxu2 %v155_v0  ;;  %v138_v3 = vld [vmem:[#allocation8 + $0x70] sm:$0xff]  ;;  %v153_v4 = vld [vmem:[#allocation8 + $0xe8] sm:$0xff]  ;;  %vm348_vm2 = vcmask 97280   ;;  %s1317_s22 = smov 64   ;;  %s1318_s23 = smov 32  }
  0x10   :  { %173 = vmatpush.xpose.msra.mxu1 %v139_v1  ;;  %v137_v5 = vld [vmem:[#allocation8 + $0x68] sm:$0xff]  ;;  %v98_v6 = vld [vmem:[#allocation5 + $0x78] sm:$0xff]  ;;  %v97_v7 = vld [vmem:[#allocation5 + $0x70] sm:$0xff]  ;;  %s1319_s26 = smov [#allocation11]   ;;  %s1113_s8 = sshll.u32 %s1595_s6, 4  ;;  %s1114_s8 = int_to_ptr.hbm [resolvable:$true] %s1113_s8 }
  0x11   :  { %99 = vmatpush.xpose.msra.mxu0 %v98_v6  ;;  %v152_v8 = vld [vmem:[#allocation8 + $0xe0] sm:$0xff]  ;;  %v96_v10 = vld [vmem:[#allocation5 + $0x68] sm:$0xff]  ;;  %v151_v11 = vld [vmem:[#allocation8 + $0xd8] sm:$0xff]  ;;  %s1111_s27 = sshll.u32 %s1319_s26, 4  ;;  %s1112_s27 = int_to_ptr.vmem [resolvable:$true] %s1111_s27 }
  0x12   :  { %v136_v9 = vld [vmem:[#allocation8 + $0x60] sm:$0xff]  ;;  %v135_v12 = vld [vmem:[#allocation8 + $0x58] sm:$0xff]  ;;  %v150_v14 = vld [vmem:[#allocation8 + $0xd0] sm:$0xff] }
  0x13   :  { %200 = vmatpush.xpose.msra.mxu2 %v154_v2  ;;  %v95_v13 = vld [vmem:[#allocation5 + $0x60] sm:$0xff]  ;;  %v134_v15 = vld [vmem:[#allocation8 + $0x50] sm:$0xff]  ;;  %v94_v16 = vld [vmem:[#allocation5 + $0x58] sm:$0xff] }
  0x14   :  { %174 = vmatpush.xpose.msra.mxu1 %v138_v3  ;;  %v149_v17 = vld [vmem:[#allocation8 + $0xc8] sm:$0xff]  ;;  %v93_v21 = vld [vmem:[#allocation5 + $0x50] sm:$0xff]  ;;  %v148_v22 = vld [vmem:[#allocation8 + $0xc0] sm:$0xff] }
  0x15   :  { %100 = vmatpush.xpose.msra.mxu0 %v97_v7  ;;  %v133_v18 = vld [vmem:[#allocation8 + $0x48] sm:$0xff]  ;;  %v132_v23 = vld [vmem:[#allocation8 + $0x40] sm:$0xff]  ;;  %v147_v24 = vld [vmem:[#allocation8 + $0xb8] sm:$0xff] }
  0x16   :  { %v73_v19 = vld [vmem:[%s1590_s1] sm:$0xff]  ;;  %v131_v25 = vld [vmem:[#allocation8 + $0x38] sm:$0xff]  ;;  %v74_v26 = vld [vmem:[%s1590_s1 + $0x8] sm:$0xf] }
  0x17   :  { %201 = vmatpush.xpose.msra.mxu2 %v153_v4  ;;  %v81_v20 = vrot.slane %v73_v19, 4  ;;  %156 = vst [vmem:[#allocation1] ss:$2 sm:$0xff] %v73_v19  ;;  %v75_v27 = vld [vmem:[%s1590_s1 + $0x10] sm:$0xff]  ;;  %v92_v28 = vld [vmem:[#allocation5 + $0x48] sm:$0xff]  ;;  %v146_v30 = vld [vmem:[#allocation8 + $0xb0] sm:$0xff] }
  0x18   :  { %175 = vmatpush.xpose.msra.mxu1 %v137_v5  ;;  %v82_v29 = vrot.slane %v75_v27, 4  ;;  %160 = vst [vmem:[#allocation1 + $0x10] ss:$2 sm:$0xff] %v74_v26  ;;  %v130_v31 = vld [vmem:[#allocation8 + $0x30] sm:$0xff]  ;;  %v91_v32 = vld [vmem:[#allocation5 + $0x40] sm:$0xff]  ;;  %v145_v33 = vld [vmem:[#allocation8 + $0xa8] sm:$0xff] }
  0x19   :  { %101 = vmatpush.xpose.msra.mxu0 %v96_v10  ;;  %158 = vst [vmem:[#allocation1 + $0x1] ss:$2 sm:$0xff] %v81_v20  ;;  %v129_v34 = vld [vmem:[#allocation8 + $0x28] sm:$0xff]  ;;  %v76_v35 = vld [vmem:[%s1590_s1 + $0x18] sm:$0xf]  ;;  %v90_v36 = vld [vmem:[#allocation5 + $0x38] sm:$0xff] }
  0x1a   :  { %162 = vst [vmem:[#allocation1 + $0x11] ss:$2 sm:$0xff] %v75_v27  ;;  %v144_v37 = vld [vmem:[#allocation8 + $0xa0] sm:$0xff]  ;;  %v89_v39 = vld [vmem:[#allocation5 + $0x30] sm:$0xff]  ;;  %v143_v40 = vld [vmem:[#allocation8 + $0x98] sm:$0xff] }
  0x1b   :  { %202 = vmatpush.xpose.msra.mxu2 %v152_v8  ;;  %164 = vst [vmem:[#allocation1 + $0x20] ss:$2 sm:$0xff] %v82_v29  ;;  %v128_v38 = vld [vmem:[#allocation8 + $0x20] sm:$0xff]  ;;  %v127_v41 = vld [vmem:[#allocation8 + $0x18] sm:$0xff]  ;;  %v88_v42 = vld [vmem:[#allocation5 + $0x28] sm:$0xff] }
  0x1c   :  { %176 = vmatpush.xpose.msra.mxu1 %v136_v9  ;;  %166 = vst [vmem:[#allocation1 + $0x21] ss:$2 sm:$0xff] %v76_v35  ;;  %v142_v43 = vld [vmem:[#allocation8 + $0x90] sm:$0xff]  ;;  %v87_v45 = vld [vmem:[#allocation5 + $0x20] sm:$0xff]  ;;  %v141_v46 = vld [vmem:[#allocation8 + $0x88] sm:$0xff] }
  0x1d   :  { %102 = vmatpush.xpose.msra.mxu0 %v95_v13  ;;  %v126_v44 = vld [vmem:[#allocation8 + $0x10] sm:$0xff]  ;;  %v125_v47 = vld [vmem:[#allocation8 + $0x8] sm:$0xff]  ;;  %v86_v48 = vld [vmem:[#allocation5 + $0x18] sm:$0xff] }
  0x1e   :  { %v140_v49 = vld [vmem:[#allocation8 + $0x80] sm:$0xff]  ;;  %v85_v51 = vld [vmem:[#allocation5 + $0x10] sm:$0xff]  ;;  %v84_v53 = vld [vmem:[#allocation5 + $0x8] sm:$0xff] }
  0x1f   :  { %203 = vmatpush.xpose.msra.mxu2 %v151_v11  ;;  %v124_v50 = vld [vmem:[#allocation8] sm:$0xff]  ;;  %v71_v56 = vld [vmem:[%s1589_s0] sm:$0xff]  ;;  %v72_v58 = vld [vmem:[%s1589_s0 + $0x8] sm:$0xff]  ;;  %s1316_s0 = smov 96  }
  0x20   :  { %177 = vmatpush.xpose.msra.mxu1 %v135_v12  ;;  %v167_v52 = vld.sshfl [vmem:[#allocation1] sm:$0xff pattern:$0x75316420]  ;;  %v83_v54 = vld [vmem:[#allocation5] sm:$0xff] }
  0x21   :  { %103 = vmatpush.xpose.msra.mxu0 %v94_v16  ;;  %v168_v55 = vld.sshfl [vmem:[#allocation1 + $0x10] sm:$0xff pattern:$0x75316420] }
  0x23   :  { %204 = vmatpush.xpose.msra.mxu2 %v150_v14  ;;  %v169_v57 = vld.sshfl [vmem:[#allocation1 + $0x20] sm:$0xff pattern:$0x75316420] }
  0x24   :  { %178 = vmatpush.xpose.msra.mxu1 %v134_v15 }
  0x25   :  { %104 = vmatpush.xpose.msra.mxu0 %v93_v21 }
  0x27   :  { %205 = vmatpush.xpose.msra.mxu2 %v149_v17 }
  0x28   :  { %179 = vmatpush.xpose.msra.mxu1 %v133_v18 }
  0x29   :  { %105 = vmatpush.xpose.msra.mxu0 %v92_v28 }
  0x2b   :  { %206 = vmatpush.xpose.msra.mxu2 %v148_v22 }
  0x2c   :  { %180 = vmatpush.xpose.msra.mxu1 %v132_v23 }
  0x2d   :  { %106 = vmatpush.xpose.msra.mxu0 %v91_v32 }
  0x2f   :  { %207 = vmatpush.xpose.msra.mxu2 %v147_v24 }
  0x30   :  { %181 = vmatpush.xpose.msra.mxu1 %v131_v25 }
  0x31   :  { %107 = vmatpush.xpose.msra.mxu0 %v90_v36 }
  0x33   :  { %208 = vmatpush.xpose.msra.mxu2 %v146_v30 }
  0x34   :  { %182 = vmatpush.xpose.msra.mxu1 %v130_v31 }
  0x35   :  { %108 = vmatpush.xpose.msra.mxu0 %v89_v39 }
  0x37   :  { %209 = vmatpush.xpose.msra.mxu2 %v145_v33 }
  0x38   :  { %183 = vmatpush.xpose.msra.mxu1 %v129_v34 }
  0x39   :  { %109 = vmatpush.xpose.msra.mxu0 %v88_v42 }
  0x3b   :  { %210 = vmatpush.xpose.msra.mxu2 %v144_v37 }
  0x3c   :  { %184 = vmatpush.xpose.msra.mxu1 %v128_v38 }
  0x3d   :  { %110 = vmatpush.xpose.msra.mxu0 %v87_v45 }
  0x3f   :  { %211 = vmatpush.xpose.msra.mxu2 %v143_v40 }
  0x40   :  { %185 = vmatpush.xpose.msra.mxu1 %v127_v41 }
  0x41   :  { %111 = vmatpush.xpose.msra.mxu0 %v86_v48 }
  0x43   :  { %212 = vmatpush.xpose.msra.mxu2 %v142_v43 }
  0x44   :  { %186 = vmatpush.xpose.msra.mxu1 %v126_v44 }
  0x45   :  { %112 = vmatpush.xpose.msra.mxu0 %v85_v51 }
  0x47   :  { %213 = vmatpush.xpose.msra.mxu2 %v141_v46 }
  0x48   :  { %187 = vmatpush.xpose.msra.mxu1 %v125_v47 }
  0x49   :  { %113 = vmatpush.xpose.msra.mxu0 %v84_v53 }
  0x4b   :  { %214 = vmatpush.xpose.msra.mxu2 %v140_v49 }
  0x4c   :  { %188 = vmatpush.xpose.msra.mxu1 %v124_v50 }
  0x4d   :  { %114 = vmatpush.xpose.msra.mxu0 %v83_v54 }
  0x4e   :  { %215 = vmatmul.f32.vlgmr.msra.gmra.mxu2 %v167_v52 }
  0x4f   :  { %189 = vmatmul.f32.vlgmr.msra.gmra.mxu1 %v167_v52 }
  0x50   :  { %115 = vmatmul.f32.vlgmr.msra.gmra.mxu0 %v71_v56 }
  0x56   :  { %218 = vmatmul.f32.gmra.mxu2 %v168_v55 }
  0x57   :  { %192 = vmatmul.f32.gmra.mxu1 %v168_v55 }
  0x58   :  { %118 = vmatmul.f32.gmra.mxu0 %v72_v58 }
  0x5e   :  { %221 = vmatmul.f32.gmra.mxu2 %v169_v57 }
  0x5f   :  { %195 = vmatmul.f32.gmra.mxu1 %v169_v57 }
  0xcc   :  { %v190_v59 = vpop.f32.mrf.mxu1 }
  0xcd   :  { %v1409_v23 = vpop.f32.mrf.mxu0 }
  0xd1   :  { %v216_v60 = vpop.f32.mrf.mxu2 }
  0xd2   :  { %v231_v61 = vrot.slane %v216_v60, 4 }
  0xd4   :  { %v235_v62 = vsel %vm234_vm0, %v190_v59, %v231_v61  ;;  %v236_v63 = vsel %vm234_vm0, %v231_v61, %v190_v59  ;;  %v193_v1 = vpop.f32.mrf.mxu1 }
  0xd5   :  { %v237_v0 = vrot.slane %v236_v63, 4  ;;  %244 = vst [vmem:[#allocation1] ss:$2 sm:$0xff] %v235_v62  ;;  %v1418_v26 = vpop.f32.mrf.mxu0 }
  0xd7   :  { %246 = vst [vmem:[#allocation1 + $0x1] ss:$2 sm:$0xff] %v237_v0 }
  0xd9   :  { %v219_v2 = vpop.f32.mrf.mxu2 }
  0xda   :  { %v232_v3 = vrot.slane %v219_v2, 4 }
  0xdc   :  { %v238_v4 = vsel %vm234_vm0, %v193_v1, %v232_v3  ;;  %v239_v5 = vsel %vm234_vm0, %v232_v3, %v193_v1  ;;  %v196_v10 = vpop.f32.mrf.mxu1 }
  0xdd   :  { %v240_v6 = vrot.slane %v239_v5, 4  ;;  %248 = vst [vmem:[#allocation1 + $0x10] ss:$2 sm:$0xff] %v238_v4 }
  0xde   :  { %v1395_v7 = vld.sshfl [vmem:[#allocation1] sm:$0xff pattern:$0x75316420]  ;;  %v1397_v8 = vld.sshfl [vmem:[#allocation1 + $0x8] sm:$0xff pattern:$0x75316420] }
  0xdf   :  { %254 = vst [vmem:[#allocation1 + $0x20] ss:$2 sm:$0xff] %v240_v6 }
  0xe1   :  { %v222_v9 = vpop.f32.mrf.mxu2 }
  0xe2   :  { %v233_v11 = vrot.slane %v222_v9, 4 }
  0xe4   :  { %v252_v12 = vld.sshfl [vmem:[#allocation1 + $0x18] sm:$0xff pattern:$0x75316420]  ;;  %v241_v13 = vsel %vm234_vm0, %v196_v10, %v233_v11  ;;  %v242_v14 = vsel %vm234_vm0, %v233_v11, %v196_v10  ;;  %v251_v16 = vld.sshfl [vmem:[#allocation1 + $0x10] sm:$0xff pattern:$0x75316420] }
  0xe5   :  { %274 = vst [vmem:[#allocation3 + $0x10] sm:$0xf] %v252_v12  ;;  %v243_v15 = vrot.slane %v242_v14, 4 }
  0xe6   :  { %256 = vst [vmem:[#allocation1 + $0x21] ss:$2 sm:$0xff] %v241_v13 }
  0xe7   :  { %258 = vst [vmem:[#allocation1 + $0x30] ss:$2 sm:$0xff] %v243_v15 }
  0xe8   :  { %273 = vst [vmem:[#allocation3 + $0x18] sm:$0xf] %v251_v16 }
  0xec   :  { %v286_v25 = vld [vmem:[#allocation3 + $0x10] sm:$0xf] }
  0xed   :  { %v1401_v17 = vld.sshfl [vmem:[#allocation1 + $0x20] sm:$0xff pattern:$0x75316420]  ;;  %v1403_v18 = vld.sshfl [vmem:[#allocation1 + $0x28] sm:$0xff pattern:$0x75316420] }
  0xee   :  { %v262_v19 = vld.sshfl [vmem:[#allocation1 + $0x38] sm:$0xff pattern:$0x75316420]  ;;  %v261_v20 = vld.sshfl [vmem:[#allocation1 + $0x30] sm:$0xff pattern:$0x75316420] }
  0xef   :  { %278 = vst [vmem:[#allocation3 + $0x38] sm:$0xf] %v262_v19  ;;  %v454_v21 = vld [vmem:[#allocation3 + $0x18] sm:$0xf] }
  0xf0   :  { %v282_v22 = vld [vmem:[#allocation3 + $0x18] sm:$0xf]  ;;  %468 = vrot.lane.b32.xlu2 %v454_v21, %s1316_s0  ;;  %277 = vst [vmem:[#allocation3 + $0x28] sm:$0xf] %v261_v20  ;;  %v458_v20 = vld [vmem:[#allocation3 + $0x10] sm:$0xf] }
  0xf1   :  { %1127 = vmatpush.xpose.msk.msra.mxu3 %vm289_vm1, %v282_v22  ;;  %v657_v21 = vld [vmem:[#allocation3 + $0x18] sm:$0xf] }
  0xf2   :  { %v860_v22 = vld [vmem:[#allocation3 + $0x18] sm:$0xf] }
  0xf5   :  { %1128 = vmatpush.xpose.msk.msra.mxu3 %vm289_vm1, %v1395_v7 }
  0xf6   :  { %v288_v27 = vld [vmem:[#allocation3 + $0x38] sm:$0xf] }
  0xf7   :  { %v284_v24 = vld [vmem:[#allocation3 + $0x28] sm:$0xf]  ;;  %v460_v43 = vld [vmem:[#allocation3 + $0x38] sm:$0xf] }
  0xf8   :  { %1129 = vmatmul.msk.f32.vlgmr.msra.gmra.mxu3 %vm289_vm1, %v1409_v23  ;;  %466 = vrot.lane.b32.xlu2 %v1395_v7, %s1316_s0  ;;  %v456_v42 = vld [vmem:[#allocation3 + $0x28] sm:$0xf] }
  0xf9   :  { %1130 = vmatpush.xpose.msk.msrb.mxu3 %vm289_vm1, %v284_v24  ;;  %v862_v24 = vld [vmem:[#allocation3 + $0x28] sm:$0xf] }
  0xfd   :  { %1131 = vmatpush.xpose.msk.msrb.mxu3 %vm289_vm1, %v1401_v17 }
 0x100   :  { %1132 = vmatmul.msk.f32.vlgmr.msrb.gmra.mxu3 %vm289_vm1, %v1418_v26  ;;  %501 = vrot.lane.b32.xlu2 %v1401_v17, %s1316_s0 }
 0x101   :  { %1133 = vmatpush.msk.msra.mxu3 %vm234_vm0, %v286_v25 }
 0x103   :  { %418 = vmatpush.msra.mxu3 %v1397_v8 }
 0x105   :  { %1135 = vmatpush.msk.msrb.mxu3 %vm234_vm0, %v288_v27 }
 0x107   :  { %444 = vmatpush.msrb.mxu3 %v1403_v18 }
 0x108   :  { %497 = vrot.lane.b32.xlu2 %v1418_v26, %s1316_s0 }
 0x14a   :  { %v469_v52 = vpop.permute.xlu2 %468 }
 0x152   :  { %v467_v1 = vpop.permute.xlu2 %466 }
 0x15a   :  { %v502_v9 = vpop.permute.xlu2 %501 }
 0x162   :  { %v498_v11 = vpop.permute.xlu2 %497 }
 0x17b   :  { %v316_v28 = vpop.f32.mrf.mxu3 }
 0x17c   :  { %v349_v29 = vsel %vm348_vm2, %v316_v28, -inf }
 0x17d   :  { %350 = vmax.xlane.f32.xlu0 %v349_v29 }
 0x183   :  { %v345_v30 = vpop.f32.mrf.mxu3 }
 0x184   :  { %v352_v31 = vsel %vm348_vm2, %v345_v30, -inf }
 0x185   :  { %353 = vmax.xlane.f32.xlu0 %v352_v31 }
 0x199   :  { %462 = vrot.lane.b32.xlu0 %v1409_v23, %s1316_s0 }
 0x1f0   :  { %v351_v32 = vpop.xlane.xlu0 %350 }
 0x1f1   :  { %v355_v33 = vsub.f32 %v316_v28, %v351_v32 }
 0x1f3   :  { %v357_v34 = vmul.f32 1.442695, %v355_v33 }
 0x1f5   :  { %1177 = vpow2.f32 %v357_v34 }
 0x1f8   :  { %v354_v35 = vpop.xlane.xlu0 %353 }
 0x1f9   :  { %v356_v36 = vsub.f32 %v345_v30, %v354_v35 }
 0x1fb   :  { %v1178_v37 = vpop.eup %1177  ;;  %v359_v38 = vmul.f32 1.442695, %v356_v36 }
 0x1fc   :  { %v361_v39 = vsel %vm348_vm2, %v1178_v37, 0.0 }
 0x1fd   :  { %1179 = vpow2.f32 %v359_v38  ;;  %362 = vadd.xlane.f32.xlu1 %v361_v39 }
 0x203   :  { %v1180_v40 = vpop.eup %1179 }
 0x204   :  { %v364_v41 = vsel %vm348_vm2, %v1180_v40, 0.0 }
 0x205   :  { %365 = vadd.xlane.f32.xlu1 %v364_v41 }
 0x20b   :  { %v463_v10 = vpop.permute.xlu0 %462 }
 0x21e   :  { %503 = vrot.lane.b32.xlu1 %v456_v42, %s1316_s0  ;;  %v659_v42 = vld [vmem:[#allocation3 + $0x28] sm:$0xf] }
 0x226   :  { %615 = vrot.lane.b32.xlu1 %v460_v43, %s1316_s0 }
 0x22e   :  { %665 = vrot.lane.b32.xlu1 %v1409_v23, %s1317_s22 }
 0x270   :  { %v363_v44 = vpop.xlane.xlu1 %362 }
 0x271   :  { %1181 = vrcp.f32 %v363_v44  ;;  %v378_v49 = vand.u32 2147483648, %v363_v44  ;;  %v376_v51 = vand.u32 2147483647, %v363_v44  ;;  %vm372_vm4 = vweird.f32 %v363_v44 }
 0x273   :  { %v379_v55 = vor.u32 1.1754944e-38, %v378_v49  ;;  %vm377_vm6 = vcmp.eq.f32.partialorder %v376_v51, 8.507059e+37 }
 0x277   :  { %v1182_v45 = vpop.eup %1181 }
 0x278   :  { %v368_v46 = vmul.f32 %v1182_v45, %v363_v44  ;;  %v366_v47 = vpop.xlane.xlu1 %365  ;;  %vm373_vm3 = vweird.f32 %v1182_v45 }
 0x279   :  { %1183 = vrcp.f32 %v366_v47  ;;  %vm374_vm5 = vmor %vm372_vm4, %vm373_vm3  ;;  %v393_v61 = vand.u32 2147483648, %v366_v47  ;;  %v391_v63 = vand.u32 2147483647, %v366_v47  ;;  %vm387_vm8 = vweird.f32 %v366_v47 }
 0x27a   :  { %v369_v48 = vsub.f32 1.0, %v368_v46 }
 0x27b   :  { %v394_v2 = vor.u32 1.1754944e-38, %v393_v61  ;;  %vm392_vm10 = vcmp.eq.f32.partialorder %v391_v63, 8.507059e+37 }
 0x27c   :  { %v370_v50 = vmul.f32 %v1182_v45, %v369_v48 }
 0x27e   :  { %v371_v53 = vadd.f32 %v1182_v45, %v370_v50 }
 0x27f   :  { %v1184_v54 = vpop.eup %1183 }
 0x280   :  { %v375_v56 = vsel %vm374_vm5, %v1182_v45, %v371_v53  ;;  %v383_v57 = vmul.f32 %v1184_v54, %v366_v47  ;;  %vm388_vm7 = vweird.f32 %v1184_v54 }
 0x281   :  { %v380_v58 = vsel %vm377_vm6, %v379_v55, %v375_v56  ;;  %vm389_vm9 = vmor %vm387_vm8, %vm388_vm7 }
 0x282   :  { %v384_v59 = vsub.f32 1.0, %v383_v57  ;;  %v381_v60 = vmul.f32 %v1178_v37, %v380_v58 }
 0x284   :  { %v385_v62 = vmul.f32 %v1184_v54, %v384_v59  ;;  %1134 = vmatmul.msk.f32.vlgmr.msra.gmra.mxu3 %vm348_vm2, %v381_v60 }
 0x285   :  { %1137 = vmatpush.xpose.msk.msra.mxu3 %vm289_vm1, %v469_v52 }
 0x286   :  { %v386_v0 = vadd.f32 %v1184_v54, %v385_v62 }
 0x288   :  { %v390_v3 = vsel %vm389_vm9, %v1184_v54, %v386_v0 }
 0x289   :  { %v395_v4 = vsel %vm392_vm10, %v394_v2, %v390_v3  ;;  %1138 = vmatpush.xpose.msk.msra.mxu3 %vm289_vm1, %v467_v1 }
 0x28a   :  { %v396_v5 = vmul.f32 %v1180_v40, %v395_v4 }
 0x28c   :  { %1136 = vmatmul.msk.f32.vlgmr.msrb.gmra.mxu3 %vm348_vm2, %v396_v5 }
 0x290   :  { %v504_v6 = vpop.permute.xlu1 %503 }
 0x291   :  { %1140 = vmatpush.xpose.msk.msrb.mxu3 %vm289_vm1, %v504_v6 }
 0x294   :  { %1139 = vmatmul.msk.f32.vlgmr.msra.gmra.mxu3 %vm289_vm1, %v463_v10 }
 0x295   :  { %1141 = vmatpush.xpose.msk.msrb.mxu3 %vm289_vm1, %v502_v9 }
 0x298   :  { %v616_v39 = vpop.permute.xlu1 %615 }
 0x29c   :  { %1142 = vmatmul.msk.f32.vlgmr.msrb.gmra.mxu3 %vm289_vm1, %v498_v11 }
 0x307   :  { %v420_v12 = vpop.f32.mrf.mxu3 }
 0x308   :  { %449 = vst.msk [vmem:[#allocation4] sm:$0xff] %vm289_vm1, %v420_v12 }
 0x30f   :  { %v446_v13 = vpop.f32.mrf.mxu3 }
 0x310   :  { %450 = vst.msk [vmem:[#allocation4 + $0x8] sm:$0xff] %vm289_vm1, %v446_v13 }
 0x317   :  { %v493_v14 = vpop.f32.mrf.mxu3 }
 0x318   :  { %v531_v15 = vsel %vm348_vm2, %v493_v14, -inf }
 0x319   :  { %532 = vmax.xlane.f32.xlu2 %v531_v15 }
 0x31f   :  { %v528_v16 = vpop.f32.mrf.mxu3 }
 0x320   :  { %v534_v19 = vsel %vm348_vm2, %v528_v16, -inf }
 0x321   :  { %535 = vmax.xlane.f32.xlu0 %v534_v19 }
 0x331   :  { %581 = vrot.lane.b32.xlu2 %v1397_v8, %s1316_s0 }
 0x335   :  { %583 = vrot.lane.b32.xlu0 %v458_v20, %s1316_s0 }
 0x339   :  { %671 = vrot.lane.b32.xlu2 %v657_v21, %s1317_s22 }
 0x33d   :  { %613 = vrot.lane.b32.xlu0 %v1403_v18, %s1316_s0 }
 0x341   :  { %874 = vrot.lane.b32.xlu2 %v860_v22, %s1318_s23 }
 0x345   :  { %669 = vrot.lane.b32.xlu0 %v1395_v7, %s1317_s22 }
 0x34d   :  { %872 = vrot.lane.b32.xlu0 %v1395_v7, %s1318_s23 }
 0x355   :  { %909 = vrot.lane.b32.xlu0 %v862_v24, %s1318_s23  ;;  %v661_v24 = vld [vmem:[#allocation3 + $0x10] sm:$0xf] }
 0x35d   :  { %700 = vrot.lane.b32.xlu0 %v1418_v26, %s1317_s22 }
 0x38c   :  { %v533_v25 = vpop.xlane.xlu2 %532 }
 0x38d   :  { %v537_v27 = vsub.f32 %v493_v14, %v533_v25 }
 0x38f   :  { %v539_v28 = vmul.f32 1.442695, %v537_v27 }
 0x391   :  { %1185 = vpow2.f32 %v539_v28 }
 0x394   :  { %v582_v29 = vpop.permute.xlu2 %581  ;;  %v536_v30 = vpop.xlane.xlu0 %535 }
 0x395   :  { %v538_v31 = vsub.f32 %v528_v16, %v536_v30 }
 0x397   :  { %v1186_v32 = vpop.eup %1185  ;;  %v541_v33 = vmul.f32 1.442695, %v538_v31 }
 0x398   :  { %v543_v34 = vsel %vm348_vm2, %v1186_v32, 0.0 }
 0x399   :  { %1187 = vpow2.f32 %v541_v33  ;;  %544 = vadd.xlane.f32.xlu1 %v543_v34 }
 0x39c   :  { %v672_v7 = vpop.permute.xlu2 %671 }
 0x39f   :  { %v1467_v35 = vpop.eup %1187 }
 0x3a0   :  { %v546_v36 = vsel %vm348_vm2, %v1467_v35, 0.0 }
 0x3a1   :  { %547 = vadd.xlane.f32.xlu2 %v546_v36 }
 0x3a4   :  { %v875_v37 = vpop.permute.xlu2 %874 }
 0x3a5   :  { %1157 = vmatpush.xpose.msk.msrb.mxu2 %vm289_vm1, %v875_v37 }
 0x3a7   :  { %v584_v38 = vpop.permute.xlu0 %583 }
 0x3a8   :  { %1143 = vmatpush.msk.msra.mxu3 %vm234_vm0, %v584_v38 }
 0x3aa   :  { %606 = vmatpush.msra.mxu3 %v582_v29 }
 0x3ac   :  { %1145 = vmatpush.msk.msrb.mxu3 %vm234_vm0, %v616_v39 }
 0x3af   :  { %v614_v40 = vpop.permute.xlu0 %613 }
 0x3b0   :  { %638 = vmatpush.msrb.mxu3 %v614_v40 }
 0x3b2   :  { %868 = vrot.lane.b32.xlu1 %v1409_v23, %s1318_s23  ;;  %v666_v23 = vpop.permute.xlu1 %665 }
 0x3b7   :  { %v670_v41 = vpop.permute.xlu0 %669 }
 0x3b9   :  { %706 = vrot.lane.b32.xlu2 %v659_v42, %s1317_s22 }
 0x3ba   :  { %704 = vrot.lane.b32.xlu1 %v1401_v17, %s1317_s22 }
 0x3bf   :  { %v873_v43 = vpop.permute.xlu0 %872 }
 0x3c0   :  { %1158 = vmatpush.xpose.msk.msrb.mxu2 %vm289_vm1, %v873_v43 }
 0x3c1   :  { %907 = vrot.lane.b32.xlu2 %v1401_v17, %s1318_s23 }
 0x3c2   :  { %903 = vrot.lane.b32.xlu1 %v1418_v26, %s1318_s23 }
 0x3c7   :  { %v910_v44 = vpop.permute.xlu0 %909 }
 0x3c8   :  { %1160 = vmatpush.xpose.msk.msra.mxu2 %vm289_vm1, %v910_v44 }
 0x3cf   :  { %v701_v9 = vpop.permute.xlu0 %700 }
 0x40c   :  { %v545_v45 = vpop.xlane.xlu1 %544 }
 0x40d   :  { %1189 = vrcp.f32 %v545_v45  ;;  %v560_v50 = vand.u32 2147483648, %v545_v45  ;;  %v558_v52 = vand.u32 2147483647, %v545_v45  ;;  %vm554_vm12 = vweird.f32 %v545_v45 }
 0x40f   :  { %v561_v26 = vor.u32 1.1754944e-38, %v560_v50  ;;  %vm559_vm14 = vcmp.eq.f32.partialorder %v558_v52, 8.507059e+37 }
 0x413   :  { %v1190_v46 = vpop.eup %1189 }
 0x414   :  { %v550_v47 = vmul.f32 %v1190_v46, %v545_v45  ;;  %v548_v48 = vpop.xlane.xlu2 %547  ;;  %vm555_vm11 = vweird.f32 %v1190_v46  ;;  %v663_v45 = vld [vmem:[#allocation3 + $0x38] sm:$0xf] }
 0x415   :  { %1191 = vrcp.f32 %v548_v48  ;;  %vm556_vm13 = vmor %vm554_vm12, %vm555_vm11  ;;  %v575_v60 = vand.u32 2147483648, %v548_v48  ;;  %v573_v62 = vand.u32 2147483647, %v548_v48  ;;  %vm569_vm3 = vweird.f32 %v548_v48 }
 0x416   :  { %v551_v49 = vsub.f32 1.0, %v550_v47  ;;  %v864_v47 = vld [vmem:[#allocation3 + $0x10] sm:$0xf] }
 0x417   :  { %v576_v0 = vor.u32 1.1754944e-38, %v575_v60  ;;  %vm574_vm5 = vcmp.eq.f32.partialorder %v573_v62, 8.507059e+37 }
 0x418   :  { %v552_v51 = vmul.f32 %v1190_v46, %v551_v49 }
 0x41a   :  { %v553_v53 = vadd.f32 %v1190_v46, %v552_v51 }
 0x41b   :  { %v1192_v17 = vpop.eup %1191 }
 0x41c   :  { %v557_v54 = vsel %vm556_vm13, %v1190_v46, %v553_v53  ;;  %v565_v55 = vmul.f32 %v1192_v17, %v548_v48  ;;  %v707_v56 = vpop.permute.xlu2 %706  ;;  %vm570_vm15 = vweird.f32 %v1192_v17  ;;  %v866_v46 = vld [vmem:[#allocation3 + $0x38] sm:$0xf] }
 0x41d   :  { %v562_v57 = vsel %vm559_vm14, %v561_v26, %v557_v54  ;;  %1150 = vmatpush.xpose.msk.msrb.mxu0 %vm289_vm1, %v707_v56  ;;  %vm571_vm4 = vmor %vm569_vm3, %vm570_vm15 }
 0x41e   :  { %v566_v58 = vsub.f32 1.0, %v565_v55  ;;  %v563_v59 = vmul.f32 %v1186_v32, %v562_v57 }
 0x420   :  { %v567_v61 = vmul.f32 %v1192_v17, %v566_v58  ;;  %1144 = vmatmul.msk.f32.vlgmr.msra.gmra.mxu3 %vm348_vm2, %v563_v59 }
 0x421   :  { %1147 = vmatpush.xpose.msk.msra.mxu3 %vm289_vm1, %v672_v7 }
 0x422   :  { %v568_v63 = vadd.f32 %v1192_v17, %v567_v61 }
 0x424   :  { %v572_v1 = vsel %vm571_vm4, %v1192_v17, %v568_v63  ;;  %v869_v2 = vpop.permute.xlu1 %868  ;;  %v908_v3 = vpop.permute.xlu2 %907 }
 0x425   :  { %v577_v4 = vsel %vm574_vm5, %v576_v0, %v572_v1  ;;  %1148 = vmatpush.xpose.msk.msra.mxu3 %vm289_vm1, %v670_v41  ;;  %1159 = vmatmul.msk.f32.vlgmr.msrb.gmra.mxu2 %vm289_vm1, %v869_v2  ;;  %vm651_vm5 = vcmask 523520  }
 0x426   :  { %1161 = vmatpush.xpose.msk.msra.mxu2 %vm289_vm1, %v908_v3  ;;  %v578_v5 = vmul.f32 %v1467_v35, %v577_v4 }
 0x428   :  { %1146 = vmatmul.msk.f32.vlgmr.msrb.gmra.mxu3 %vm348_vm2, %v578_v5 }
 0x42c   :  { %v705_v6 = vpop.permute.xlu1 %704 }
 0x42d   :  { %1151 = vmatpush.xpose.msk.msrb.mxu0 %vm289_vm1, %v705_v6 }
 0x430   :  { %1149 = vmatmul.msk.f32.vlgmr.msra.gmra.mxu3 %vm289_vm1, %v666_v23  ;;  %1152 = vmatmul.msk.f32.vlgmr.msrb.gmra.mxu0 %vm289_vm1, %v701_v9 }
 0x434   :  { %v904_v10 = vpop.permute.xlu1 %903 }
 0x435   :  { %1162 = vmatmul.msk.f32.vlgmr.msra.gmra.mxu2 %vm289_vm1, %v904_v10 }
 0x4a3   :  { %v608_v11 = vpop.f32.mrf.mxu3 }
 0x4a8   :  { %v899_v12 = vpop.f32.mrf.mxu2 }
 0x4a9   :  { %v937_v13 = vsel %vm348_vm2, %v899_v12, -inf }
 0x4aa   :  { %938 = vmax.xlane.f32.xlu0 %v937_v13 }
 0x4ab   :  { %v640_v14 = vpop.f32.mrf.mxu3 }
 0x4ad   :  { %v731_v15 = vpop.f32.mrf.mxu0 }
 0x4ae   :  { %v737_v16 = vsel %vm348_vm2, %v731_v15, -inf }
 0x4af   :  { %738 = vmax.xlane.f32.xlu1 %v737_v16 }
 0x4b3   :  { %v696_v19 = vpop.f32.mrf.mxu3 }
 0x4b4   :  { %v734_v20 = vsel %vm348_vm2, %v696_v19, -inf }
 0x4b5   :  { %735 = vmax.xlane.f32.xlu2 %v734_v20 }
 0x4b8   :  { %v934_v21 = vpop.f32.mrf.mxu2 }
 0x4b9   :  { %v940_v22 = vsel %vm348_vm2, %v934_v21, -inf }
 0x4bd   :  { %941 = vmax.xlane.f32.xlu2 %v940_v22 }
 0x4be   :  { %786 = vrot.lane.b32.xlu0 %v661_v24, %s1317_s22 }
 0x4c6   :  { %987 = vrot.lane.b32.xlu0 %v1397_v8, %s1318_s23 }
 0x4ce   :  { %816 = vrot.lane.b32.xlu0 %v1403_v18, %s1317_s22 }
 0x51d   :  { %v939_v25 = vpop.xlane.xlu0 %938 }
 0x51e   :  { %v943_v27 = vsub.f32 %v899_v12, %v939_v25 }
 0x520   :  { %v945_v28 = vmul.f32 1.442695, %v943_v27 }
 0x522   :  { %1193 = vpow2.f32 %v945_v28  ;;  %v739_v29 = vpop.xlane.xlu1 %738 }
 0x523   :  { %v741_v30 = vsub.f32 %v731_v15, %v739_v29 }
 0x525   :  { %v744_v31 = vmul.f32 1.442695, %v741_v30 }
 0x527   :  { %1195 = vpow2.f32 %v744_v31 }
 0x528   :  { %v1506_v32 = vpop.eup %1193  ;;  %v736_v33 = vpop.xlane.xlu2 %735 }
 0x529   :  { %v740_v34 = vsub.f32 %v696_v19, %v736_v33  ;;  %v949_v7 = vsel %vm348_vm2, %v1506_v32, 0.0 }
 0x52a   :  { %950 = vadd.xlane.f32.xlu1 %v949_v7 }
 0x52b   :  { %v742_v35 = vmul.f32 1.442695, %v740_v34 }
 0x52d   :  { %v1510_v36 = vpop.eup %1195  ;;  %1197 = vpow2.f32 %v742_v35 }
 0x52e   :  { %v749_v37 = vsel %vm348_vm2, %v1510_v36, 0.0 }
 0x52f   :  { %750 = vadd.xlane.f32.xlu2 %v749_v37 }
 0x530   :  { %v942_v38 = vpop.xlane.xlu2 %941  ;;  %v787_v39 = vpop.permute.xlu0 %786 }
 0x531   :  { %v944_v40 = vsub.f32 %v934_v21, %v942_v38  ;;  %1153 = vmatpush.msk.msrb.mxu3 %vm234_vm0, %v787_v39 }
 0x533   :  { %v1515_v41 = vpop.eup %1197  ;;  %v947_v42 = vmul.f32 1.442695, %v944_v40 }
 0x534   :  { %v746_v43 = vsel %vm348_vm2, %v1515_v41, 0.0 }
 0x535   :  { %1199 = vpow2.f32 %v947_v42  ;;  %747 = vadd.xlane.f32.xlu0 %v746_v43 }
 0x538   :  { %v988_v48 = vpop.permute.xlu0 %987 }
 0x53b   :  { %v1519_v44 = vpop.eup %1199 }
 0x53c   :  { %v952_v23 = vsel %vm348_vm2, %v1519_v44, 0.0 }
 0x53d   :  { %953 = vadd.xlane.f32.xlu2 %v952_v23 }
 0x540   :  { %v1532_v50 = vpop.permute.xlu0 %816 }
 0x543   :  { %784 = vrot.lane.b32.xlu1 %v1397_v8, %s1317_s22 }
 0x549   :  { %1019 = vrot.lane.b32.xlu0 %v1403_v18, %s1318_s23 }
 0x54b   :  { %818 = vrot.lane.b32.xlu1 %v663_v45, %s1317_s22  ;;  %v1077_v45 = vld [vmem:[#allocation10 + $0x78] sm:$0xff] }
 0x54c   :  { %1082 = vmatpush.xpose.msrb.mxu1 %v1077_v45 }
 0x553   :  { %1021 = vrot.lane.b32.xlu1 %v866_v46, %s1318_s23  ;;  %v1076_v46 = vld [vmem:[#allocation10 + $0x70] sm:$0xff] }
 0x554   :  { %1083 = vmatpush.xpose.msrb.mxu1 %v1076_v46 }
 0x555   :  { %989 = vrot.lane.b32.xlu2 %v864_v47, %s1318_s23  ;;  %v1074_v47 = vld [vmem:[#allocation10 + $0x60] sm:$0xff] }
 0x55d   :  { %645 = vrot.lane.b32.xlu2 %v608_v11, %s1318_s23 }
 0x565   :  { %647 = vrot.lane.b32.xlu2 %v640_v14, %s1318_s23 }
 0x59d   :  { %v951_v49 = vpop.xlane.xlu1 %950 }
 0x59e   :  { %1201 = vrcp.f32 %v951_v49  ;;  %vm960_vm13 = vweird.f32 %v951_v49  ;;  %v966_v14 = vand.u32 2147483648, %v951_v49  ;;  %v964_v19 = vand.u32 2147483647, %v951_v49 }
 0x5a0   :  { %v967_v29 = vor.u32 1.1754944e-38, %v966_v14  ;;  %vm965_vm4 = vcmp.eq.f32.partialorder %v964_v19, 8.507059e+37 }
 0x5a2   :  { %v751_v8 = vpop.xlane.xlu2 %750 }
 0x5a3   :  { %1203 = vrcp.f32 %v751_v8  ;;  %v778_v2 = vand.u32 2147483648, %v751_v8  ;;  %vm772_vm9 = vweird.f32 %v751_v8  ;;  %v776_v5 = vand.u32 2147483647, %v751_v8 }
 0x5a4   :  { %v1534_v18 = vpop.eup %1201 }
 0x5a5   :  { %v956_v17 = vmul.f32 %v1534_v18, %v951_v49  ;;  %vm961_vm8 = vweird.f32 %v1534_v18  ;;  %v779_v20 = vor.u32 1.1754944e-38, %v778_v2  ;;  %vm777_vm15 = vcmp.eq.f32.partialorder %v776_v5, 8.507059e+37 }
 0x5a6   :  { %vm1554_vm14 = vmor %vm960_vm13, %vm961_vm8 }
 0x5a7   :  { %v957_v55 = vsub.f32 1.0, %v956_v17  ;;  %v1068_v17 = vld [vmem:[#allocation10 + $0x30] sm:$0xff] }
 0x5a8   :  { %v748_v51 = vpop.xlane.xlu0 %747 }
 0x5a9   :  { %v1204_v52 = vpop.eup %1203  ;;  %1205 = vrcp.f32 %v748_v51  ;;  %v763_v60 = vand.u32 2147483648, %v748_v51  ;;  %v958_v61 = vmul.f32 %v1534_v18, %v957_v55  ;;  %v761_v63 = vand.u32 2147483647, %v748_v51  ;;  %v1065_v55 = vld [vmem:[#allocation10 + $0x18] sm:$0xff] }
 0x5aa   :  { %v768_v53 = vmul.f32 %v1204_v52, %v751_v8  ;;  %vm773_vm6 = vweird.f32 %v1204_v52  ;;  %vm757_vm7 = vweird.f32 %v748_v51  ;;  %v1071_v8 = vld [vmem:[#allocation10 + $0x48] sm:$0xff] }
 0x5ab   :  { %v764_v6 = vor.u32 1.1754944e-38, %v763_v60  ;;  %v959_v9 = vadd.f32 %v1534_v18, %v958_v61  ;;  %vm1543_vm11 = vmor %vm772_vm9, %vm773_vm6  ;;  %vm762_vm12 = vcmp.eq.f32.partialorder %v761_v63, 8.507059e+37 }
 0x5ac   :  { %v769_v26 = vsub.f32 1.0, %v768_v53 }
 0x5ad   :  { %v963_v25 = vsel %vm1554_vm14, %v1534_v18, %v959_v9 }
 0x5ae   :  { %v770_v58 = vmul.f32 %v1204_v52, %v769_v26  ;;  %v968_v34 = vsel %vm965_vm4, %v967_v29, %v963_v25  ;;  %v1067_v26 = vld [vmem:[#allocation10 + $0x28] sm:$0xff] }
 0x5af   :  { %v1206_v54 = vpop.eup %1205  ;;  %v969_v40 = vmul.f32 %v1506_v32, %v968_v34  ;;  %v1075_v32 = vld [vmem:[#allocation10 + $0x68] sm:$0xff] }
 0x5b0   :  { %v753_v56 = vmul.f32 %v1206_v54, %v748_v51  ;;  %v1537_v57 = vpop.xlane.xlu2 %953  ;;  %vm758_vm1 = vweird.f32 %v1206_v54  ;;  %v771_v0 = vadd.f32 %v1204_v52, %v770_v58  ;;  %1084 = vmatpush.xpose.msrb.mxu1 %v1075_v32  ;;  %v1070_v51 = vld [vmem:[#allocation10 + $0x40] sm:$0xff] }
 0x5b1   :  { %1207 = vrcp.f32 %v1537_v57  ;;  %vm759_vm10 = vmor %vm757_vm7, %vm758_vm1  ;;  %v981_v33 = vand.u32 2147483648, %v1537_v57  ;;  %vm975_vm1 = vweird.f32 %v1537_v57  ;;  %v979_v7 = vand.u32 2147483647, %v1537_v57  ;;  %v1062_v58 = vld [vmem:[#allocation10] sm:$0xff] }
 0x5b2   :  { %v754_v59 = vsub.f32 1.0, %v753_v56  ;;  %v775_v15 = vsel %vm1543_vm11, %v1204_v52, %v771_v0  ;;  %v1069_v52 = vld [vmem:[#allocation10 + $0x38] sm:$0xff]  ;;  %v1064_v56 = vld [vmem:[#allocation10 + $0x10] sm:$0xff] }
 0x5b3   :  { %v780_v27 = vsel %vm777_vm15, %v779_v20, %v775_v15  ;;  %v982_v39 = vor.u32 1.1754944e-38, %v981_v33  ;;  %vm980_vm7 = vcmp.eq.f32.partialorder %v979_v7, 8.507059e+37 }
 0x5b4   :  { %v755_v62 = vmul.f32 %v1206_v54, %v754_v59  ;;  %v781_v35 = vmul.f32 %v1510_v36, %v780_v27  ;;  %1085 = vmatpush.xpose.msrb.mxu1 %v1074_v47 }
 0x5b5   :  { %v785_v1 = vpop.permute.xlu1 %784 }
 0x5b6   :  { %v756_v3 = vadd.f32 %v1206_v54, %v755_v62  ;;  %809 = vmatpush.msrb.mxu3 %v785_v1  ;;  %v1176_v1 = vld [vmem:[%s1594_s5] ss:$0 sm:$0xff] }
 0x5b7   :  { %v1208_v4 = vpop.eup %1207 }
 0x5b8   :  { %v760_v11 = vsel %vm759_vm10, %v1206_v54, %v756_v3  ;;  %v971_v12 = vmul.f32 %v1208_v4, %v1537_v57  ;;  %v990_v13 = vpop.permute.xlu2 %989  ;;  %vm976_vm3 = vweird.f32 %v1208_v4  ;;  %v1066_v54 = vld [vmem:[#allocation10 + $0x20] sm:$0xff]  ;;  %v1063_v57 = vld [vmem:[#allocation10 + $0x8] sm:$0xff] }
 0x5b9   :  { %v765_v16 = vsel %vm762_vm12, %v764_v6, %v760_v11  ;;  %1163 = vmatpush.msk.msra.mxu3 %vm234_vm0, %v990_v13  ;;  %vm977_vm6 = vmor %vm975_vm1, %vm976_vm3 }
 0x5ba   :  { %v972_v21 = vsub.f32 1.0, %v971_v12  ;;  %v766_v22 = vmul.f32 %v1515_v41, %v765_v16 }
 0x5bb   :  { %1012 = vmatpush.msra.mxu3 %v988_v48  ;;  %v1020_v36 = vpop.permute.xlu0 %1019  ;;  %v1073_v48 = vld [vmem:[#allocation10 + $0x58] sm:$0xff] }
 0x5bc   :  { %v973_v28 = vmul.f32 %v1208_v4, %v972_v21  ;;  %1154 = vmatmul.msk.f32.vlgmr.msrb.gmra.mxu3 %vm348_vm2, %v766_v22  ;;  %1086 = vmatpush.xpose.msrb.mxu1 %v1073_v48 }
 0x5bd   :  { %v819_v30 = vpop.permute.xlu1 %818 }
 0x5be   :  { %v974_v31 = vadd.f32 %v1208_v4, %v973_v28  ;;  %1155 = vmatpush.msk.msra.mxu0 %vm234_vm0, %v819_v30 }
 0x5c0   :  { %v646_v37 = vpop.permute.xlu2 %645  ;;  %841 = vmatpush.msra.mxu0 %v1532_v50  ;;  %v978_v38 = vsel %vm977_vm6, %v1208_v4, %v974_v31 }
 0x5c1   :  { %652 = vst.msk [vmem:[#allocation4] sm:$0xff] %vm651_vm5, %v646_v37  ;;  %1156 = vmatmul.msk.f32.vlgmr.msra.gmra.mxu0 %vm348_vm2, %v781_v35  ;;  %v983_v41 = vsel %vm980_vm7, %v982_v39, %v978_v38 }
 0x5c2   :  { %v984_v43 = vmul.f32 %v1519_v44, %v983_v41  ;;  %v1072_v44 = vld [vmem:[#allocation10 + $0x50] sm:$0xff] }
 0x5c3   :  { %1087 = vmatpush.xpose.msrb.mxu1 %v1072_v44 }
 0x5c4   :  { %1164 = vmatmul.msk.f32.vlgmr.msra.gmra.mxu3 %vm348_vm2, %v969_v40 }
 0x5c5   :  { %v1022_v42 = vpop.permute.xlu1 %1021 }
 0x5c6   :  { %1165 = vmatpush.msk.msrb.mxu0 %vm234_vm0, %v1022_v42  ;;  %vm854_vm0 = vcmask 785920  }
 0x5c7   :  { %1088 = vmatpush.xpose.msrb.mxu1 %v1071_v8 }
 0x5c8   :  { %v648_v23 = vpop.permute.xlu2 %647  ;;  %1044 = vmatpush.msrb.mxu0 %v1020_v36 }
 0x5c9   :  { %653 = vst.msk [vmem:[#allocation4 + $0x8] sm:$0xff] %vm651_vm5, %v648_v23  ;;  %1166 = vmatmul.msk.f32.vlgmr.msrb.gmra.mxu0 %vm348_vm2, %v984_v43  ;;  %vm1057_vm2 = vcmask 1048320  }
 0x5cb   :  { %1089 = vmatpush.xpose.msrb.mxu1 %v1070_v51 }
 0x5cf   :  { %1090 = vmatpush.xpose.msrb.mxu1 %v1069_v52 }
 0x5d3   :  { %1091 = vmatpush.xpose.msrb.mxu1 %v1068_v17 }
 0x5d7   :  { %1092 = vmatpush.xpose.msrb.mxu1 %v1067_v26 }
 0x5db   :  { %1093 = vmatpush.xpose.msrb.mxu1 %v1066_v54 }
 0x5df   :  { %1094 = vmatpush.xpose.msrb.mxu1 %v1065_v55 }
 0x5e3   :  { %1095 = vmatpush.xpose.msrb.mxu1 %v1064_v56 }
 0x5e7   :  { %1096 = vmatpush.xpose.msrb.mxu1 %v1063_v57 }
 0x5eb   :  { %1097 = vmatpush.xpose.msrb.mxu1 %v1062_v58 }
 0x63e   :  { %v843_v50 = vpop.f32.mrf.mxu0 }
 0x63f   :  { %v811_v49 = vpop.f32.mrf.mxu3 }
 0x640   :  { %848 = vrot.lane.b32.xlu1 %v811_v49, %s1317_s22 }
 0x646   :  { %v1046_v53 = vpop.f32.mrf.mxu0 }
 0x647   :  { %v1014_v18 = vpop.f32.mrf.mxu3 }
 0x648   :  { %850 = vrot.lane.b32.xlu1 %v843_v50, %s1317_s22  ;;  %1051 = vrot.lane.b32.xlu0 %v1014_v18, %s1316_s0 }
 0x650   :  { %1053 = vrot.lane.b32.xlu0 %v1046_v53, %s1316_s0 }
 0x6b2   :  { %v849_v59 = vpop.permute.xlu1 %848 }
 0x6b3   :  { %855 = vst.msk [vmem:[#allocation4] sm:$0xff] %vm854_vm0, %v849_v59 }
 0x6ba   :  { %v851_v60 = vpop.permute.xlu1 %850  ;;  %v1052_v61 = vpop.permute.xlu0 %1051 }
 0x6bb   :  { %856 = vst.msk [vmem:[#allocation4 + $0x8] sm:$0xff] %vm854_vm0, %v851_v60 }
 0x6bc   :  { %1058 = vst.msk [vmem:[#allocation4] sm:$0xff] %vm1057_vm2, %v1052_v61 }
 0x6c2   :  { %v1054_v62 = vpop.permute.xlu0 %1053 }
 0x6c3   :  { %1059 = vst.msk [vmem:[#allocation4 + $0x8] sm:$0xff] %vm1057_vm2, %v1054_v62  ;;  %v1060_v63 = vld [vmem:[#allocation4] sm:$0xff] }
 0x6c4   :  { %1098 = vmatmul.f32.vlgmr.msrb.gmra.mxu1 %v1060_v63 }
 0x6ca   :  { %v1061_v0 = vld [vmem:[#allocation4 + $0x8] sm:$0xff] }
 0x6cc   :  { %1101 = vmatmul.f32.gmra.mxu1 %v1061_v0 }
 0x741   :  { %v1099_v2 = vpop.f32.mrf.mxu1 }
 0x742   :  { %v1100_v3 = vadd.f32 %v1176_v1, %v1099_v2 }
 0x744   :  { %1105 = vst [vmem:[#allocation11] sm:$0xff] %v1100_v3 }
 0x749   :  { %v1102_v4 = vpop.f32.mrf.mxu1 }
 0x74a   :  { %v1103_v5 = vadd.f32 %v1176_v1, %v1102_v4 }
 0x74c   :  { %1106 = vst [vmem:[#allocation11 + $0x8] sm:$0xff] %v1103_v5 }
 0x74d   :  { %1119 = dma.vmem_to_hbm [thread:$0]  %s1112_s27, 256, %s1114_s8, [#allocation7], %s1312_s29, %s1312_s29, %s1313_s30  }
 0x74e   :  { %1309 = dma.done.wait [#allocation7], 256  }
 0x74f   :  { %1310 = vsyncadd [#allocation7], 4294967040 }
 0x750   :  { %1124 = vsyncpa [#allocation6], 1 }
 0x751   :  { %1125 = vsyncpa [#allocation9], 1 }
 0x752   :  { %1126 = vsyncpa [#allocation7], 1 }

// kernel: tpu_custom_call.1
= control target key start
LH: loop header
LB: loop body
LE: loop exit
PB: predicated region body
PF: predicated region fallthrough
CT: control target
= control target key end

     0   :  { %11 = vsyncpa [#allocation6], 0  ;;  %s1589_s0 = inlined_call_operand.vmem [shape: f32[2,8,128], index: 0, kind: input, shape index: {}]   ;;  %s1590_s1 = inlined_call_operand.vmem [shape: f32[2,12,128], index: 1, kind: input, shape index: {}]   ;;  %s1591_s2 = inlined_call_operand.hbm [shape: f32[128,128], index: 2, kind: input, shape index: {}]   ;;  %s1592_s3 = inlined_call_operand.hbm [shape: f32[256,128], index: 3, kind: input, shape index: {}]   ;;  %s1593_s4 = inlined_call_operand.hbm [shape: f32[128,128], index: 4, kind: input, shape index: {}]   ;;  %s1594_s5 = inlined_call_operand.vmem [shape: f32[1,128], index: 5, kind: input, shape index: {}]   ;;  %s1595_s6 = inlined_call_operand.hbm [shape: f32[2,8,128], index: 6, kind: output, shape index: {}]  }
   0x1   :  { %12 = vsyncpa [#allocation9], 0 }
   0x2   :  { %13 = vsyncpa [#allocation7], 0  ;;  %s35_s23 = sshll.u32 %s1592_s3, 4  ;;  %s1311_s24 = smov [#allocation8]   ;;  %s36_s23 = int_to_ptr.hbm [resolvable:$true] %s35_s23 }
   0x3   :  { %s37_s25 = sshll.u32 %s1311_s24, 4  ;;  %s22_s28 = sshll.u32 %s1591_s2, 4  ;;  %s38_s25 = int_to_ptr.vmem [resolvable:$true] %s37_s25  ;;  %s23_s28 = int_to_ptr.hbm [resolvable:$true] %s22_s28 }
   0x4   :  { %s1312_s29 = smov 128   ;;  %s1313_s30 = smov 8  }
   0x5   :  { %43 = dma.hbm_to_vmem [thread:$0]  %s36_s23, 4096, %s38_s25, [#allocation9], %s1312_s29, %s1312_s29, %s1313_s30  }
   0x6   :  { %s1314_s7 = smov [#allocation5]   ;;  %s48_s3 = sshll.u32 %s1593_s4, 4  ;;  %s49_s3 = int_to_ptr.hbm [resolvable:$true] %s48_s3 }
   0x7   :  { %s24_s8 = sshll.u32 %s1314_s7, 4  ;;  %s1315_s2 = smov [#allocation10]   ;;  %s25_s8 = int_to_ptr.vmem [resolvable:$true] %s24_s8 }
   0x8   :  { %30 = dma.hbm_to_vmem [thread:$0]  %s23_s28, 2048, %s25_s8, [#allocation6], %s1312_s29, %s1312_s29, %s1313_s30  }
   0x9   :  { %s50_s11 = sshll.u32 %s1315_s2, 4  ;;  %s51_s11 = int_to_ptr.vmem [resolvable:$true] %s50_s11 }
   0xa   :  { %56 = dma.hbm_to_vmem [thread:$0]  %s49_s3, 2048, %s51_s11, [#allocation9], %s1312_s29, %s1312_s29, %s1313_s30  }
   0xb   :  { %1305 = dma.done.wait [#allocation6], 2048  }
   0xc   :  { %1306 = vsyncadd [#allocation6], 4294965248 }
   0xd   :  { %1307 = dma.done.wait [#allocation9], 6144  }
   0xe   :  { %1308 = vsyncadd [#allocation9], 4294961152  ;;  %v155_v0 = vld [vmem:[#allocation8 + $0xf8] sm:$0xff]  ;;  %v154_v2 = vld [vmem:[#allocation8 + $0xf0] sm:$0xff]  ;;  %vm234_vm0 = vcmask 1043456   ;;  %vm289_vm1 = vcmask 261120  }
   0xf   :  { %v139_v1 = vld [vmem:[#allocation8 + $0x78] sm:$0xff]  ;;  %199 = vmatpush.xpose.msra.mxu2 %v155_v0  ;;  %v138_v3 = vld [vmem:[#allocation8 + $0x70] sm:$0xff]  ;;  %v153_v4 = vld [vmem:[#allocation8 + $0xe8] sm:$0xff]  ;;  %vm348_vm2 = vcmask 97280   ;;  %s1317_s22 = smov 64   ;;  %s1318_s23 = smov 32  }
  0x10   :  { %173 = vmatpush.xpose.msra.mxu1 %v139_v1  ;;  %v137_v5 = vld [vmem:[#allocation8 + $0x68] sm:$0xff]  ;;  %v98_v6 = vld [vmem:[#allocation5 + $0x78] sm:$0xff]  ;;  %v97_v7 = vld [vmem:[#allocation5 + $0x70] sm:$0xff]  ;;  %s1319_s26 = smov [#allocation11]   ;;  %s1113_s8 = sshll.u32 %s1595_s6, 4  ;;  %s1114_s8 = int_to_ptr.hbm [resolvable:$true] %s1113_s8 }
  0x11   :  { %99 = vmatpush.xpose.msra.mxu0 %v98_v6  ;;  %v152_v8 = vld [vmem:[#allocation8 + $0xe0] sm:$0xff]  ;;  %v96_v10 = vld [vmem:[#allocation5 + $0x68] sm:$0xff]  ;;  %v151_v11 = vld [vmem:[#allocation8 + $0xd8] sm:$0xff]  ;;  %s1111_s27 = sshll.u32 %s1319_s26, 4  ;;  %s1112_s27 = int_to_ptr.vmem [resolvable:$true] %s1111_s27 }
  0x12   :  { %v136_v9 = vld [vmem:[#allocation8 + $0x60] sm:$0xff]  ;;  %v135_v12 = vld [vmem:[#allocation8 + $0x58] sm:$0xff]  ;;  %v150_v14 = vld [vmem:[#allocation8 + $0xd0] sm:$0xff] }
  0x13   :  { %200 = vmatpush.xpose.msra.mxu2 %v154_v2  ;;  %v95_v13 = vld [vmem:[#allocation5 + $0x60] sm:$0xff]  ;;  %v134_v15 = vld [vmem:[#allocation8 + $0x50] sm:$0xff]  ;;  %v94_v16 = vld [vmem:[#allocation5 + $0x58] sm:$0xff] }
  0x14   :  { %174 = vmatpush.xpose.msra.mxu1 %v138_v3  ;;  %v149_v17 = vld [vmem:[#allocation8 + $0xc8] sm:$0xff]  ;;  %v93_v21 = vld [vmem:[#allocation5 + $0x50] sm:$0xff]  ;;  %v148_v22 = vld [vmem:[#allocation8 + $0xc0] sm:$0xff] }
  0x15   :  { %100 = vmatpush.xpose.msra.mxu0 %v97_v7  ;;  %v133_v18 = vld [vmem:[#allocation8 + $0x48] sm:$0xff]  ;;  %v132_v23 = vld [vmem:[#allocation8 + $0x40] sm:$0xff]  ;;  %v147_v24 = vld [vmem:[#allocation8 + $0xb8] sm:$0xff] }
  0x16   :  { %v73_v19 = vld [vmem:[%s1590_s1] sm:$0xff]  ;;  %v131_v25 = vld [vmem:[#allocation8 + $0x38] sm:$0xff]  ;;  %v74_v26 = vld [vmem:[%s1590_s1 + $0x8] sm:$0xf] }
  0x17   :  { %201 = vmatpush.xpose.msra.mxu2 %v153_v4  ;;  %v81_v20 = vrot.slane %v73_v19, 4  ;;  %156 = vst [vmem:[#allocation1] ss:$2 sm:$0xff] %v73_v19  ;;  %v75_v27 = vld [vmem:[%s1590_s1 + $0x10] sm:$0xff]  ;;  %v92_v28 = vld [vmem:[#allocation5 + $0x48] sm:$0xff]  ;;  %v146_v30 = vld [vmem:[#allocation8 + $0xb0] sm:$0xff] }
  0x18   :  { %175 = vmatpush.xpose.msra.mxu1 %v137_v5  ;;  %v82_v29 = vrot.slane %v75_v27, 4  ;;  %160 = vst [vmem:[#allocation1 + $0x10] ss:$2 sm:$0xff] %v74_v26  ;;  %v130_v31 = vld [vmem:[#allocation8 + $0x30] sm:$0xff]  ;;  %v91_v32 = vld [vmem:[#allocation5 + $0x40] sm:$0xff]  ;;  %v145_v33 = vld [vmem:[#allocation8 + $0xa8] sm:$0xff] }
  0x19   :  { %101 = vmatpush.xpose.msra.mxu0 %v96_v10  ;;  %158 = vst [vmem:[#allocation1 + $0x1] ss:$2 sm:$0xff] %v81_v20  ;;  %v129_v34 = vld [vmem:[#allocation8 + $0x28] sm:$0xff]  ;;  %v76_v35 = vld [vmem:[%s1590_s1 + $0x18] sm:$0xf]  ;;  %v90_v36 = vld [vmem:[#allocation5 + $0x38] sm:$0xff] }
  0x1a   :  { %162 = vst [vmem:[#allocation1 + $0x11] ss:$2 sm:$0xff] %v75_v27  ;;  %v144_v37 = vld [vmem:[#allocation8 + $0xa0] sm:$0xff]  ;;  %v89_v39 = vld [vmem:[#allocation5 + $0x30] sm:$0xff]  ;;  %v143_v40 = vld [vmem:[#allocation8 + $0x98] sm:$0xff] }
  0x1b   :  { %202 = vmatpush.xpose.msra.mxu2 %v152_v8  ;;  %164 = vst [vmem:[#allocation1 + $0x20] ss:$2 sm:$0xff] %v82_v29  ;;  %v128_v38 = vld [vmem:[#allocation8 + $0x20] sm:$0xff]  ;;  %v127_v41 = vld [vmem:[#allocation8 + $0x18] sm:$0xff]  ;;  %v88_v42 = vld [vmem:[#allocation5 + $0x28] sm:$0xff] }
  0x1c   :  { %176 = vmatpush.xpose.msra.mxu1 %v136_v9  ;;  %166 = vst [vmem:[#allocation1 + $0x21] ss:$2 sm:$0xff] %v76_v35  ;;  %v142_v43 = vld [vmem:[#allocation8 + $0x90] sm:$0xff]  ;;  %v87_v45 = vld [vmem:[#allocation5 + $0x20] sm:$0xff]  ;;  %v141_v46 = vld [vmem:[#allocation8 + $0x88] sm:$0xff] }
  0x1d   :  { %102 = vmatpush.xpose.msra.mxu0 %v95_v13  ;;  %v126_v44 = vld [vmem:[#allocation8 + $0x10] sm:$0xff]  ;;  %v125_v47 = vld [vmem:[#allocation8 + $0x8] sm:$0xff]  ;;  %v86_v48 = vld [vmem:[#allocation5 + $0x18] sm:$0xff] }
  0x1e   :  { %v140_v49 = vld [vmem:[#allocation8 + $0x80] sm:$0xff]  ;;  %v85_v51 = vld [vmem:[#allocation5 + $0x10] sm:$0xff]  ;;  %v84_v53 = vld [vmem:[#allocation5 + $0x8] sm:$0xff] }
  0x1f   :  { %203 = vmatpush.xpose.msra.mxu2 %v151_v11  ;;  %v124_v50 = vld [vmem:[#allocation8] sm:$0xff]  ;;  %v71_v56 = vld [vmem:[%s1589_s0] sm:$0xff]  ;;  %v72_v58 = vld [vmem:[%s1589_s0 + $0x8] sm:$0xff]  ;;  %s1316_s0 = smov 96  }
  0x20   :  { %177 = vmatpush.xpose.msra.mxu1 %v135_v12  ;;  %v167_v52 = vld.sshfl [vmem:[#allocation1] sm:$0xff pattern:$0x75316420]  ;;  %v83_v54 = vld [vmem:[#allocation5] sm:$0xff] }
  0x21   :  { %103 = vmatpush.xpose.msra.mxu0 %v94_v16  ;;  %v168_v55 = vld.sshfl [vmem:[#allocation1 + $0x10] sm:$0xff pattern:$0x75316420] }
  0x23   :  { %204 = vmatpush.xpose.msra.mxu2 %v150_v14  ;;  %v169_v57 = vld.sshfl [vmem:[#allocation1 + $0x20] sm:$0xff pattern:$0x75316420] }
  0x24   :  { %178 = vmatpush.xpose.msra.mxu1 %v134_v15 }
  0x25   :  { %104 = vmatpush.xpose.msra.mxu0 %v93_v21 }
  0x27   :  { %205 = vmatpush.xpose.msra.mxu2 %v149_v17 }
  0x28   :  { %179 = vmatpush.xpose.msra.mxu1 %v133_v18 }
  0x29   :  { %105 = vmatpush.xpose.msra.mxu0 %v92_v28 }
  0x2b   :  { %206 = vmatpush.xpose.msra.mxu2 %v148_v22 }
  0x2c   :  { %180 = vmatpush.xpose.msra.mxu1 %v132_v23 }
  0x2d   :  { %106 = vmatpush.xpose.msra.mxu0 %v91_v32 }
  0x2f   :  { %207 = vmatpush.xpose.msra.mxu2 %v147_v24 }
  0x30   :  { %181 = vmatpush.xpose.msra.mxu1 %v131_v25 }
  0x31   :  { %107 = vmatpush.xpose.msra.mxu0 %v90_v36 }
  0x33   :  { %208 = vmatpush.xpose.msra.mxu2 %v146_v30 }
  0x34   :  { %182 = vmatpush.xpose.msra.mxu1 %v130_v31 }
  0x35   :  { %108 = vmatpush.xpose.msra.mxu0 %v89_v39 }
  0x37   :  { %209 = vmatpush.xpose.msra.mxu2 %v145_v33 }
  0x38   :  { %183 = vmatpush.xpose.msra.mxu1 %v129_v34 }
  0x39   :  { %109 = vmatpush.xpose.msra.mxu0 %v88_v42 }
  0x3b   :  { %210 = vmatpush.xpose.msra.mxu2 %v144_v37 }
  0x3c   :  { %184 = vmatpush.xpose.msra.mxu1 %v128_v38 }
  0x3d   :  { %110 = vmatpush.xpose.msra.mxu0 %v87_v45 }
  0x3f   :  { %211 = vmatpush.xpose.msra.mxu2 %v143_v40 }
  0x40   :  { %185 = vmatpush.xpose.msra.mxu1 %v127_v41 }
  0x41   :  { %111 = vmatpush.xpose.msra.mxu0 %v86_v48 }
  0x43   :  { %212 = vmatpush.xpose.msra.mxu2 %v142_v43 }
  0x44   :  { %186 = vmatpush.xpose.msra.mxu1 %v126_v44 }
  0x45   :  { %112 = vmatpush.xpose.msra.mxu0 %v85_v51 }
  0x47   :  { %213 = vmatpush.xpose.msra.mxu2 %v141_v46 }
  0x48   :  { %187 = vmatpush.xpose.msra.mxu1 %v125_v47 }
  0x49   :  { %113 = vmatpush.xpose.msra.mxu0 %v84_v53 }
  0x4b   :  { %214 = vmatpush.xpose.msra.mxu2 %v140_v49 }
  0x4c   :  { %188 = vmatpush.xpose.msra.mxu1 %v124_v50 }
  0x4d   :  { %114 = vmatpush.xpose.msra.mxu0 %v83_v54 }
  0x4e   :  { %215 = vmatmul.f32.vlgmr.msra.gmra.mxu2 %v167_v52 }
  0x4f   :  { %189 = vmatmul.f32.vlgmr.msra.gmra.mxu1 %v167_v52 }
  0x50   :  { %115 = vmatmul.f32.vlgmr.msra.gmra.mxu0 %v71_v56 }
  0x56   :  { %218 = vmatmul.f32.gmra.mxu2 %v168_v55 }
  0x57   :  { %192 = vmatmul.f32.gmra.mxu1 %v168_v55 }
  0x58   :  { %118 = vmatmul.f32.gmra.mxu0 %v72_v58 }
  0x5e   :  { %221 = vmatmul.f32.gmra.mxu2 %v169_v57 }
  0x5f   :  { %195 = vmatmul.f32.gmra.mxu1 %v169_v57 }
  0xcc   :  { %v190_v59 = vpop.f32.mrf.mxu1 }
  0xcd   :  { %v1409_v23 = vpop.f32.mrf.mxu0 }
  0xd1   :  { %v216_v60 = vpop.f32.mrf.mxu2 }
  0xd2   :  { %v231_v61 = vrot.slane %v216_v60, 4 }
  0xd4   :  { %v235_v62 = vsel %vm234_vm0, %v190_v59, %v231_v61  ;;  %v236_v63 = vsel %vm234_vm0, %v231_v61, %v190_v59  ;;  %v193_v1 = vpop.f32.mrf.mxu1 }
  0xd5   :  { %v237_v0 = vrot.slane %v236_v63, 4  ;;  %244 = vst [vmem:[#allocation1] ss:$2 sm:$0xff] %v235_v62  ;;  %v1418_v26 = vpop.f32.mrf.mxu0 }
  0xd7   :  { %246 = vst [vmem:[#allocation1 + $0x1] ss:$2 sm:$0xff] %v237_v0 }
  0xd9   :  { %v219_v2 = vpop.f32.mrf.mxu2 }
  0xda   :  { %v232_v3 = vrot.slane %v219_v2, 4 }
  0xdc   :  { %v238_v4 = vsel %vm234_vm0, %v193_v1, %v232_v3  ;;  %v239_v5 = vsel %vm234_vm0, %v232_v3, %v193_v1  ;;  %v196_v10 = vpop.f32.mrf.mxu1 }
  0xdd   :  { %v240_v6 = vrot.slane %v239_v5, 4  ;;  %248 = vst [vmem:[#allocation1 + $0x10] ss:$2 sm:$0xff] %v238_v4 }
  0xde   :  { %v1395_v7 = vld.sshfl [vmem:[#allocation1] sm:$0xff pattern:$0x75316420]  ;;  %v1397_v8 = vld.sshfl [vmem:[#allocation1 + $0x8] sm:$0xff pattern:$0x75316420] }
  0xdf   :  { %254 = vst [vmem:[#allocation1 + $0x20] ss:$2 sm:$0xff] %v240_v6 }
  0xe1   :  { %v222_v9 = vpop.f32.mrf.mxu2 }
  0xe2   :  { %v233_v11 = vrot.slane %v222_v9, 4 }
  0xe4   :  { %v252_v12 = vld.sshfl [vmem:[#allocation1 + $0x18] sm:$0xff pattern:$0x75316420]  ;;  %v241_v13 = vsel %vm234_vm0, %v196_v10, %v233_v11  ;;  %v242_v14 = vsel %vm234_vm0, %v233_v11, %v196_v10  ;;  %v251_v16 = vld.sshfl [vmem:[#allocation1 + $0x10] sm:$0xff pattern:$0x75316420] }
  0xe5   :  { %274 = vst [vmem:[#allocation3 + $0x10] sm:$0xf] %v252_v12  ;;  %v243_v15 = vrot.slane %v242_v14, 4 }
  0xe6   :  { %256 = vst [vmem:[#allocation1 + $0x21] ss:$2 sm:$0xff] %v241_v13 }
  0xe7   :  { %258 = vst [vmem:[#allocation1 + $0x30] ss:$2 sm:$0xff] %v243_v15 }
  0xe8   :  { %273 = vst [vmem:[#allocation3 + $0x18] sm:$0xf] %v251_v16 }
  0xec   :  { %v286_v25 = vld [vmem:[#allocation3 + $0x10] sm:$0xf] }
  0xed   :  { %v1401_v17 = vld.sshfl [vmem:[#allocation1 + $0x20] sm:$0xff pattern:$0x75316420]  ;;  %v1403_v18 = vld.sshfl [vmem:[#allocation1 + $0x28] sm:$0xff pattern:$0x75316420] }
  0xee   :  { %v262_v19 = vld.sshfl [vmem:[#allocation1 + $0x38] sm:$0xff pattern:$0x75316420]  ;;  %v261_v20 = vld.sshfl [vmem:[#allocation1 + $0x30] sm:$0xff pattern:$0x75316420] }
  0xef   :  { %278 = vst [vmem:[#allocation3 + $0x38] sm:$0xf] %v262_v19  ;;  %v454_v21 = vld [vmem:[#allocation3 + $0x18] sm:$0xf] }
  0xf0   :  { %v282_v22 = vld [vmem:[#allocation3 + $0x18] sm:$0xf]  ;;  %468 = vrot.lane.b32.xlu2 %v454_v21, %s1316_s0  ;;  %277 = vst [vmem:[#allocation3 + $0x28] sm:$0xf] %v261_v20  ;;  %v458_v20 = vld [vmem:[#allocation3 + $0x10] sm:$0xf] }
  0xf1   :  { %1127 = vmatpush.xpose.msk.msra.mxu3 %vm289_vm1, %v282_v22  ;;  %v657_v21 = vld [vmem:[#allocation3 + $0x18] sm:$0xf] }
  0xf2   :  { %v860_v22 = vld [vmem:[#allocation3 + $0x18] sm:$0xf] }
  0xf5   :  { %1128 = vmatpush.xpose.msk.msra.mxu3 %vm289_vm1, %v1395_v7 }
  0xf6   :  { %v288_v27 = vld [vmem:[#allocation3 + $0x38] sm:$0xf] }
  0xf7   :  { %v284_v24 = vld [vmem:[#allocation3 + $0x28] sm:$0xf]  ;;  %v460_v43 = vld [vmem:[#allocation3 + $0x38] sm:$0xf] }
  0xf8   :  { %1129 = vmatmul.msk.f32.vlgmr.msra.gmra.mxu3 %vm289_vm1, %v1409_v23  ;;  %466 = vrot.lane.b32.xlu2 %v1395_v7, %s1316_s0  ;;  %v456_v42 = vld [vmem:[#allocation3 + $0x28] sm:$0xf] }
  0xf9   :  { %1130 = vmatpush.xpose.msk.msrb.mxu3 %vm289_vm1, %v284_v24  ;;  %v862_v24 = vld [vmem:[#allocation3 + $0x28] sm:$0xf] }
  0xfd   :  { %1131 = vmatpush.xpose.msk.msrb.mxu3 %vm289_vm1, %v1401_v17 }
 0x100   :  { %1132 = vmatmul.msk.f32.vlgmr.msrb.gmra.mxu3 %vm289_vm1, %v1418_v26  ;;  %501 = vrot.lane.b32.xlu2 %v1401_v17, %s1316_s0 }
 0x101   :  { %1133 = vmatpush.msk.msra.mxu3 %vm234_vm0, %v286_v25 }
 0x103   :  { %418 = vmatpush.msra.mxu3 %v1397_v8 }
 0x105   :  { %1135 = vmatpush.msk.msrb.mxu3 %vm234_vm0, %v288_v27 }
 0x107   :  { %444 = vmatpush.msrb.mxu3 %v1403_v18 }
 0x108   :  { %497 = vrot.lane.b32.xlu2 %v1418_v26, %s1316_s0 }
 0x14a   :  { %v469_v52 = vpop.permute.xlu2 %468 }
 0x152   :  { %v467_v1 = vpop.permute.xlu2 %466 }
 0x15a   :  { %v502_v9 = vpop.permute.xlu2 %501 }
 0x162   :  { %v498_v11 = vpop.permute.xlu2 %497 }
 0x17b   :  { %v316_v28 = vpop.f32.mrf.mxu3 }
 0x17c   :  { %v349_v29 = vsel %vm348_vm2, %v316_v28, -inf }
 0x17d   :  { %350 = vmax.xlane.f32.xlu0 %v349_v29 }
 0x183   :  { %v345_v30 = vpop.f32.mrf.mxu3 }
 0x184   :  { %v352_v31 = vsel %vm348_vm2, %v345_v30, -inf }
 0x185   :  { %353 = vmax.xlane.f32.xlu0 %v352_v31 }
 0x199   :  { %462 = vrot.lane.b32.xlu0 %v1409_v23, %s1316_s0 }
 0x1f0   :  { %v351_v32 = vpop.xlane.xlu0 %350 }
 0x1f1   :  { %v355_v33 = vsub.f32 %v316_v28, %v351_v32 }
 0x1f3   :  { %v357_v34 = vmul.f32 1.442695, %v355_v33 }
 0x1f5   :  { %1177 = vpow2.f32 %v357_v34 }
 0x1f8   :  { %v354_v35 = vpop.xlane.xlu0 %353 }
 0x1f9   :  { %v356_v36 = vsub.f32 %v345_v30, %v354_v35 }
 0x1fb   :  { %v1178_v37 = vpop.eup %1177  ;;  %v359_v38 = vmul.f32 1.442695, %v356_v36 }
 0x1fc   :  { %v361_v39 = vsel %vm348_vm2, %v1178_v37, 0.0 }
 0x1fd   :  { %1179 = vpow2.f32 %v359_v38  ;;  %362 = vadd.xlane.f32.xlu1 %v361_v39 }
 0x203   :  { %v1180_v40 = vpop.eup %1179 }
 0x204   :  { %v364_v41 = vsel %vm348_vm2, %v1180_v40, 0.0 }
 0x205   :  { %365 = vadd.xlane.f32.xlu1 %v364_v41 }
 0x20b   :  { %v463_v10 = vpop.permute.xlu0 %462 }
 0x21e   :  { %503 = vrot.lane.b32.xlu1 %v456_v42, %s1316_s0  ;;  %v659_v42 = vld [vmem:[#allocation3 + $0x28] sm:$0xf] }
 0x226   :  { %615 = vrot.lane.b32.xlu1 %v460_v43, %s1316_s0 }
 0x22e   :  { %665 = vrot.lane.b32.xlu1 %v1409_v23, %s1317_s22 }
 0x270   :  { %v363_v44 = vpop.xlane.xlu1 %362 }
 0x271   :  { %1181 = vrcp.f32 %v363_v44  ;;  %v378_v49 = vand.u32 2147483648, %v363_v44  ;;  %v376_v51 = vand.u32 2147483647, %v363_v44  ;;  %vm372_vm4 = vweird.f32 %v363_v44 }
 0x273   :  { %v379_v55 = vor.u32 1.1754944e-38, %v378_v49  ;;  %vm377_vm6 = vcmp.eq.f32.partialorder %v376_v51, 8.507059e+37 }
 0x277   :  { %v1182_v45 = vpop.eup %1181 }
 0x278   :  { %v368_v46 = vmul.f32 %v1182_v45, %v363_v44  ;;  %v366_v47 = vpop.xlane.xlu1 %365  ;;  %vm373_vm3 = vweird.f32 %v1182_v45 }
 0x279   :  { %1183 = vrcp.f32 %v366_v47  ;;  %vm374_vm5 = vmor %vm372_vm4, %vm373_vm3  ;;  %v393_v61 = vand.u32 2147483648, %v366_v47  ;;  %v391_v63 = vand.u32 2147483647, %v366_v47  ;;  %vm387_vm8 = vweird.f32 %v366_v47 }
 0x27a   :  { %v369_v48 = vsub.f32 1.0, %v368_v46 }
 0x27b   :  { %v394_v2 = vor.u32 1.1754944e-38, %v393_v61  ;;  %vm392_vm10 = vcmp.eq.f32.partialorder %v391_v63, 8.507059e+37 }
 0x27c   :  { %v370_v50 = vmul.f32 %v1182_v45, %v369_v48 }
 0x27e   :  { %v371_v53 = vadd.f32 %v1182_v45, %v370_v50 }
 0x27f   :  { %v1184_v54 = vpop.eup %1183 }
 0x280   :  { %v375_v56 = vsel %vm374_vm5, %v1182_v45, %v371_v53  ;;  %v383_v57 = vmul.f32 %v1184_v54, %v366_v47  ;;  %vm388_vm7 = vweird.f32 %v1184_v54 }
 0x281   :  { %v380_v58 = vsel %vm377_vm6, %v379_v55, %v375_v56  ;;  %vm389_vm9 = vmor %vm387_vm8, %vm388_vm7 }
 0x282   :  { %v384_v59 = vsub.f32 1.0, %v383_v57  ;;  %v381_v60 = vmul.f32 %v1178_v37, %v380_v58 }
 0x284   :  { %v385_v62 = vmul.f32 %v1184_v54, %v384_v59  ;;  %1134 = vmatmul.msk.f32.vlgmr.msra.gmra.mxu3 %vm348_vm2, %v381_v60 }
 0x285   :  { %1137 = vmatpush.xpose.msk.msra.mxu3 %vm289_vm1, %v469_v52 }
 0x286   :  { %v386_v0 = vadd.f32 %v1184_v54, %v385_v62 }
 0x288   :  { %v390_v3 = vsel %vm389_vm9, %v1184_v54, %v386_v0 }
 0x289   :  { %v395_v4 = vsel %vm392_vm10, %v394_v2, %v390_v3  ;;  %1138 = vmatpush.xpose.msk.msra.mxu3 %vm289_vm1, %v467_v1 }
 0x28a   :  { %v396_v5 = vmul.f32 %v1180_v40, %v395_v4 }
 0x28c   :  { %1136 = vmatmul.msk.f32.vlgmr.msrb.gmra.mxu3 %vm348_vm2, %v396_v5 }
 0x290   :  { %v504_v6 = vpop.permute.xlu1 %503 }
 0x291   :  { %1140 = vmatpush.xpose.msk.msrb.mxu3 %vm289_vm1, %v504_v6 }
 0x294   :  { %1139 = vmatmul.msk.f32.vlgmr.msra.gmra.mxu3 %vm289_vm1, %v463_v10 }
 0x295   :  { %1141 = vmatpush.xpose.msk.msrb.mxu3 %vm289_vm1, %v502_v9 }
 0x298   :  { %v616_v39 = vpop.permute.xlu1 %615 }
 0x29c   :  { %1142 = vmatmul.msk.f32.vlgmr.msrb.gmra.mxu3 %vm289_vm1, %v498_v11 }
 0x307   :  { %v420_v12 = vpop.f32.mrf.mxu3 }
 0x308   :  { %449 = vst.msk [vmem:[#allocation4] sm:$0xff] %vm289_vm1, %v420_v12 }
 0x30f   :  { %v446_v13 = vpop.f32.mrf.mxu3 }
 0x310   :  { %450 = vst.msk [vmem:[#allocation4 + $0x8] sm:$0xff] %vm289_vm1, %v446_v13 }
 0x317   :  { %v493_v14 = vpop.f32.mrf.mxu3 }
 0x318   :  { %v531_v15 = vsel %vm348_vm2, %v493_v14, -inf }
 0x319   :  { %532 = vmax.xlane.f32.xlu2 %v531_v15 }
 0x31f   :  { %v528_v16 = vpop.f32.mrf.mxu3 }
 0x320   :  { %v534_v19 = vsel %vm348_vm2, %v528_v16, -inf }
 0x321   :  { %535 = vmax.xlane.f32.xlu0 %v534_v19 }
 0x331   :  { %581 = vrot.lane.b32.xlu2 %v1397_v8, %s1316_s0 }
 0x335   :  { %583 = vrot.lane.b32.xlu0 %v458_v20, %s1316_s0 }
 0x339   :  { %671 = vrot.lane.b32.xlu2 %v657_v21, %s1317_s22 }
 0x33d   :  { %613 = vrot.lane.b32.xlu0 %v1403_v18, %s1316_s0 }
 0x341   :  { %874 = vrot.lane.b32.xlu2 %v860_v22, %s1318_s23 }
 0x345   :  { %669 = vrot.lane.b32.xlu0 %v1395_v7, %s1317_s22 }
 0x34d   :  { %872 = vrot.lane.b32.xlu0 %v1395_v7, %s1318_s23 }
 0x355   :  { %909 = vrot.lane.b32.xlu0 %v862_v24, %s1318_s23  ;;  %v661_v24 = vld [vmem:[#allocation3 + $0x10] sm:$0xf] }
 0x35d   :  { %700 = vrot.lane.b32.xlu0 %v1418_v26, %s1317_s22 }
 0x38c   :  { %v533_v25 = vpop.xlane.xlu2 %532 }
 0x38d   :  { %v537_v27 = vsub.f32 %v493_v14, %v533_v25 }
 0x38f   :  { %v539_v28 = vmul.f32 1.442695, %v537_v27 }
 0x391   :  { %1185 = vpow2.f32 %v539_v28 }
 0x394   :  { %v582_v29 = vpop.permute.xlu2 %581  ;;  %v536_v30 = vpop.xlane.xlu0 %535 }
 0x395   :  { %v538_v31 = vsub.f32 %v528_v16, %v536_v30 }
 0x397   :  { %v1186_v32 = vpop.eup %1185  ;;  %v541_v33 = vmul.f32 1.442695, %v538_v31 }
 0x398   :  { %v543_v34 = vsel %vm348_vm2, %v1186_v32, 0.0 }
 0x399   :  { %1187 = vpow2.f32 %v541_v33  ;;  %544 = vadd.xlane.f32.xlu1 %v543_v34 }
 0x39c   :  { %v672_v7 = vpop.permute.xlu2 %671 }
 0x39f   :  { %v1467_v35 = vpop.eup %1187 }
 0x3a0   :  { %v546_v36 = vsel %vm348_vm2, %v1467_v35, 0.0 }
 0x3a1   :  { %547 = vadd.xlane.f32.xlu2 %v546_v36 }
 0x3a4   :  { %v875_v37 = vpop.permute.xlu2 %874 }
 0x3a5   :  { %1157 = vmatpush.xpose.msk.msrb.mxu2 %vm289_vm1, %v875_v37 }
 0x3a7   :  { %v584_v38 = vpop.permute.xlu0 %583 }
 0x3a8   :  { %1143 = vmatpush.msk.msra.mxu3 %vm234_vm0, %v584_v38 }
 0x3aa   :  { %606 = vmatpush.msra.mxu3 %v582_v29 }
 0x3ac   :  { %1145 = vmatpush.msk.msrb.mxu3 %vm234_vm0, %v616_v39 }
 0x3af   :  { %v614_v40 = vpop.permute.xlu0 %613 }
 0x3b0   :  { %638 = vmatpush.msrb.mxu3 %v614_v40 }
 0x3b2   :  { %868 = vrot.lane.b32.xlu1 %v1409_v23, %s1318_s23  ;;  %v666_v23 = vpop.permute.xlu1 %665 }
 0x3b7   :  { %v670_v41 = vpop.permute.xlu0 %669 }
 0x3b9   :  { %706 = vrot.lane.b32.xlu2 %v659_v42, %s1317_s22 }
 0x3ba   :  { %704 = vrot.lane.b32.xlu1 %v1401_v17, %s1317_s22 }
 0x3bf   :  { %v873_v43 = vpop.permute.xlu0 %872 }
 0x3c0   :  { %1158 = vmatpush.xpose.msk.msrb.mxu2 %vm289_vm1, %v873_v43 }
 0x3c1   :  { %907 = vrot.lane.b32.xlu2 %v1401_v17, %s1318_s23 }
 0x3c2   :  { %903 = vrot.lane.b32.xlu1 %v1418_v26, %s1318_s23 }
 0x3c7   :  { %v910_v44 = vpop.permute.xlu0 %909 }
 0x3c8   :  { %1160 = vmatpush.xpose.msk.msra.mxu2 %vm289_vm1, %v910_v44 }
 0x3cf   :  { %v701_v9 = vpop.permute.xlu0 %700 }
 0x40c   :  { %v545_v45 = vpop.xlane.xlu1 %544 }
 0x40d   :  { %1189 = vrcp.f32 %v545_v45  ;;  %v560_v50 = vand.u32 2147483648, %v545_v45  ;;  %v558_v52 = vand.u32 2147483647, %v545_v45  ;;  %vm554_vm12 = vweird.f32 %v545_v45 }
 0x40f   :  { %v561_v26 = vor.u32 1.1754944e-38, %v560_v50  ;;  %vm559_vm14 = vcmp.eq.f32.partialorder %v558_v52, 8.507059e+37 }
 0x413   :  { %v1190_v46 = vpop.eup %1189 }
 0x414   :  { %v550_v47 = vmul.f32 %v1190_v46, %v545_v45  ;;  %v548_v48 = vpop.xlane.xlu2 %547  ;;  %vm555_vm11 = vweird.f32 %v1190_v46  ;;  %v663_v45 = vld [vmem:[#allocation3 + $0x38] sm:$0xf] }
 0x415   :  { %1191 = vrcp.f32 %v548_v48  ;;  %vm556_vm13 = vmor %vm554_vm12, %vm555_vm11  ;;  %v575_v60 = vand.u32 2147483648, %v548_v48  ;;  %v573_v62 = vand.u32 2147483647, %v548_v48  ;;  %vm569_vm3 = vweird.f32 %v548_v48 }
 0x416   :  { %v551_v49 = vsub.f32 1.0, %v550_v47  ;;  %v864_v47 = vld [vmem:[#allocation3 + $0x10] sm:$0xf] }
 0x417   :  { %v576_v0 = vor.u32 1.1754944e-38, %v575_v60  ;;  %vm574_vm5 = vcmp.eq.f32.partialorder %v573_v62, 8.507059e+37 }
 0x418   :  { %v552_v51 = vmul.f32 %v1190_v46, %v551_v49 }
 0x41a   :  { %v553_v53 = vadd.f32 %v1190_v46, %v552_v51 }
 0x41b   :  { %v1192_v17 = vpop.eup %1191 }
 0x41c   :  { %v557_v54 = vsel %vm556_vm13, %v1190_v46, %v553_v53  ;;  %v565_v55 = vmul.f32 %v1192_v17, %v548_v48  ;;  %v707_v56 = vpop.permute.xlu2 %706  ;;  %vm570_vm15 = vweird.f32 %v1192_v17  ;;  %v866_v46 = vld [vmem:[#allocation3 + $0x38] sm:$0xf] }
 0x41d   :  { %v562_v57 = vsel %vm559_vm14, %v561_v26, %v557_v54  ;;  %1150 = vmatpush.xpose.msk.msrb.mxu0 %vm289_vm1, %v707_v56  ;;  %vm571_vm4 = vmor %vm569_vm3, %vm570_vm15 }
 0x41e   :  { %v566_v58 = vsub.f32 1.0, %v565_v55  ;;  %v563_v59 = vmul.f32 %v1186_v32, %v562_v57 }
 0x420   :  { %v567_v61 = vmul.f32 %v1192_v17, %v566_v58  ;;  %1144 = vmatmul.msk.f32.vlgmr.msra.gmra.mxu3 %vm348_vm2, %v563_v59 }
 0x421   :  { %1147 = vmatpush.xpose.msk.msra.mxu3 %vm289_vm1, %v672_v7 }
 0x422   :  { %v568_v63 = vadd.f32 %v1192_v17, %v567_v61 }
 0x424   :  { %v572_v1 = vsel %vm571_vm4, %v1192_v17, %v568_v63  ;;  %v869_v2 = vpop.permute.xlu1 %868  ;;  %v908_v3 = vpop.permute.xlu2 %907 }
 0x425   :  { %v577_v4 = vsel %vm574_vm5, %v576_v0, %v572_v1  ;;  %1148 = vmatpush.xpose.msk.msra.mxu3 %vm289_vm1, %v670_v41  ;;  %1159 = vmatmul.msk.f32.vlgmr.msrb.gmra.mxu2 %vm289_vm1, %v869_v2  ;;  %vm651_vm5 = vcmask 523520  }
 0x426   :  { %1161 = vmatpush.xpose.msk.msra.mxu2 %vm289_vm1, %v908_v3  ;;  %v578_v5 = vmul.f32 %v1467_v35, %v577_v4 }
 0x428   :  { %1146 = vmatmul.msk.f32.vlgmr.msrb.gmra.mxu3 %vm348_vm2, %v578_v5 }
 0x42c   :  { %v705_v6 = vpop.permute.xlu1 %704 }
 0x42d   :  { %1151 = vmatpush.xpose.msk.msrb.mxu0 %vm289_vm1, %v705_v6 }
 0x430   :  { %1149 = vmatmul.msk.f32.vlgmr.msra.gmra.mxu3 %vm289_vm1, %v666_v23  ;;  %1152 = vmatmul.msk.f32.vlgmr.msrb.gmra.mxu0 %vm289_vm1, %v701_v9 }
 0x434   :  { %v904_v10 = vpop.permute.xlu1 %903 }
 0x435   :  { %1162 = vmatmul.msk.f32.vlgmr.msra.gmra.mxu2 %vm289_vm1, %v904_v10 }
 0x4a3   :  { %v608_v11 = vpop.f32.mrf.mxu3 }
 0x4a8   :  { %v899_v12 = vpop.f32.mrf.mxu2 }
 0x4a9   :  { %v937_v13 = vsel %vm348_vm2, %v899_v12, -inf }
 0x4aa   :  { %938 = vmax.xlane.f32.xlu0 %v937_v13 }
 0x4ab   :  { %v640_v14 = vpop.f32.mrf.mxu3 }
 0x4ad   :  { %v731_v15 = vpop.f32.mrf.mxu0 }
 0x4ae   :  { %v737_v16 = vsel %vm348_vm2, %v731_v15, -inf }
 0x4af   :  { %738 = vmax.xlane.f32.xlu1 %v737_v16 }
 0x4b3   :  { %v696_v19 = vpop.f32.mrf.mxu3 }
 0x4b4   :  { %v734_v20 = vsel %vm348_vm2, %v696_v19, -inf }
 0x4b5   :  { %735 = vmax.xlane.f32.xlu2 %v734_v20 }
 0x4b8   :  { %v934_v21 = vpop.f32.mrf.mxu2 }
 0x4b9   :  { %v940_v22 = vsel %vm348_vm2, %v934_v21, -inf }
 0x4bd   :  { %941 = vmax.xlane.f32.xlu2 %v940_v22 }
 0x4be   :  { %786 = vrot.lane.b32.xlu0 %v661_v24, %s1317_s22 }
 0x4c6   :  { %987 = vrot.lane.b32.xlu0 %v1397_v8, %s1318_s23 }
 0x4ce   :  { %816 = vrot.lane.b32.xlu0 %v1403_v18, %s1317_s22 }
 0x51d   :  { %v939_v25 = vpop.xlane.xlu0 %938 }
 0x51e   :  { %v943_v27 = vsub.f32 %v899_v12, %v939_v25 }
 0x520   :  { %v945_v28 = vmul.f32 1.442695, %v943_v27 }
 0x522   :  { %1193 = vpow2.f32 %v945_v28  ;;  %v739_v29 = vpop.xlane.xlu1 %738 }
 0x523   :  { %v741_v30 = vsub.f32 %v731_v15, %v739_v29 }
 0x525   :  { %v744_v31 = vmul.f32 1.442695, %v741_v30 }
 0x527   :  { %1195 = vpow2.f32 %v744_v31 }
 0x528   :  { %v1506_v32 = vpop.eup %1193  ;;  %v736_v33 = vpop.xlane.xlu2 %735 }
 0x529   :  { %v740_v34 = vsub.f32 %v696_v19, %v736_v33  ;;  %v949_v7 = vsel %vm348_vm2, %v1506_v32, 0.0 }
 0x52a   :  { %950 = vadd.xlane.f32.xlu1 %v949_v7 }
 0x52b   :  { %v742_v35 = vmul.f32 1.442695, %v740_v34 }
 0x52d   :  { %v1510_v36 = vpop.eup %1195  ;;  %1197 = vpow2.f32 %v742_v35 }
 0x52e   :  { %v749_v37 = vsel %vm348_vm2, %v1510_v36, 0.0 }
 0x52f   :  { %750 = vadd.xlane.f32.xlu2 %v749_v37 }
 0x530   :  { %v942_v38 = vpop.xlane.xlu2 %941  ;;  %v787_v39 = vpop.permute.xlu0 %786 }
 0x531   :  { %v944_v40 = vsub.f32 %v934_v21, %v942_v38  ;;  %1153 = vmatpush.msk.msrb.mxu3 %vm234_vm0, %v787_v39 }
 0x533   :  { %v1515_v41 = vpop.eup %1197  ;;  %v947_v42 = vmul.f32 1.442695, %v944_v40 }
 0x534   :  { %v746_v43 = vsel %vm348_vm2, %v1515_v41, 0.0 }
 0x535   :  { %1199 = vpow2.f32 %v947_v42  ;;  %747 = vadd.xlane.f32.xlu0 %v746_v43 }
 0x538   :  { %v988_v48 = vpop.permute.xlu0 %987 }
 0x53b   :  { %v1519_v44 = vpop.eup %1199 }
 0x53c   :  { %v952_v23 = vsel %vm348_vm2, %v1519_v44, 0.0 }
 0x53d   :  { %953 = vadd.xlane.f32.xlu2 %v952_v23 }
 0x540   :  { %v1532_v50 = vpop.permute.xlu0 %816 }
 0x543   :  { %784 = vrot.lane.b32.xlu1 %v1397_v8, %s1317_s22 }
 0x549   :  { %1019 = vrot.lane.b32.xlu0 %v1403_v18, %s1318_s23 }
 0x54b   :  { %818 = vrot.lane.b32.xlu1 %v663_v45, %s1317_s22  ;;  %v1077_v45 = vld [vmem:[#allocation10 + $0x78] sm:$0xff] }
 0x54c   :  { %1082 = vmatpush.xpose.msrb.mxu1 %v1077_v45 }
 0x553   :  { %1021 = vrot.lane.b32.xlu1 %v866_v46, %s1318_s23  ;;  %v1076_v46 = vld [vmem:[#allocation10 + $0x70] sm:$0xff] }
 0x554   :  { %1083 = vmatpush.xpose.msrb.mxu1 %v1076_v46 }
 0x555   :  { %989 = vrot.lane.b32.xlu2 %v864_v47, %s1318_s23  ;;  %v1074_v47 = vld [vmem:[#allocation10 + $0x60] sm:$0xff] }
 0x55d   :  { %645 = vrot.lane.b32.xlu2 %v608_v11, %s1318_s23 }
 0x565   :  { %647 = vrot.lane.b32.xlu2 %v640_v14, %s1318_s23 }
 0x59d   :  { %v951_v49 = vpop.xlane.xlu1 %950 }
 0x59e   :  { %1201 = vrcp.f32 %v951_v49  ;;  %vm960_vm13 = vweird.f32 %v951_v49  ;;  %v966_v14 = vand.u32 2147483648, %v951_v49  ;;  %v964_v19 = vand.u32 2147483647, %v951_v49 }
 0x5a0   :  { %v967_v29 = vor.u32 1.1754944e-38, %v966_v14  ;;  %vm965_vm4 = vcmp.eq.f32.partialorder %v964_v19, 8.507059e+37 }
 0x5a2   :  { %v751_v8 = vpop.xlane.xlu2 %750 }
 0x5a3   :  { %1203 = vrcp.f32 %v751_v8  ;;  %v778_v2 = vand.u32 2147483648, %v751_v8  ;;  %vm772_vm9 = vweird.f32 %v751_v8  ;;  %v776_v5 = vand.u32 2147483647, %v751_v8 }
 0x5a4   :  { %v1534_v18 = vpop.eup %1201 }
 0x5a5   :  { %v956_v17 = vmul.f32 %v1534_v18, %v951_v49  ;;  %vm961_vm8 = vweird.f32 %v1534_v18  ;;  %v779_v20 = vor.u32 1.1754944e-38, %v778_v2  ;;  %vm777_vm15 = vcmp.eq.f32.partialorder %v776_v5, 8.507059e+37 }
 0x5a6   :  { %vm1554_vm14 = vmor %vm960_vm13, %vm961_vm8 }
 0x5a7   :  { %v957_v55 = vsub.f32 1.0, %v956_v17  ;;  %v1068_v17 = vld [vmem:[#allocation10 + $0x30] sm:$0xff] }
 0x5a8   :  { %v748_v51 = vpop.xlane.xlu0 %747 }
 0x5a9   :  { %v1204_v52 = vpop.eup %1203  ;;  %1205 = vrcp.f32 %v748_v51  ;;  %v763_v60 = vand.u32 2147483648, %v748_v51  ;;  %v958_v61 = vmul.f32 %v1534_v18, %v957_v55  ;;  %v761_v63 = vand.u32 2147483647, %v748_v51  ;;  %v1065_v55 = vld [vmem:[#allocation10 + $0x18] sm:$0xff] }
 0x5aa   :  { %v768_v53 = vmul.f32 %v1204_v52, %v751_v8  ;;  %vm773_vm6 = vweird.f32 %v1204_v52  ;;  %vm757_vm7 = vweird.f32 %v748_v51  ;;  %v1071_v8 = vld [vmem:[#allocation10 + $0x48] sm:$0xff] }
 0x5ab   :  { %v764_v6 = vor.u32 1.1754944e-38, %v763_v60  ;;  %v959_v9 = vadd.f32 %v1534_v18, %v958_v61  ;;  %vm1543_vm11 = vmor %vm772_vm9, %vm773_vm6  ;;  %vm762_vm12 = vcmp.eq.f32.partialorder %v761_v63, 8.507059e+37 }
 0x5ac   :  { %v769_v26 = vsub.f32 1.0, %v768_v53 }
 0x5ad   :  { %v963_v25 = vsel %vm1554_vm14, %v1534_v18, %v959_v9 }
 0x5ae   :  { %v770_v58 = vmul.f32 %v1204_v52, %v769_v26  ;;  %v968_v34 = vsel %vm965_vm4, %v967_v29, %v963_v25  ;;  %v1067_v26 = vld [vmem:[#allocation10 + $0x28] sm:$0xff] }
 0x5af   :  { %v1206_v54 = vpop.eup %1205  ;;  %v969_v40 = vmul.f32 %v1506_v32, %v968_v34  ;;  %v1075_v32 = vld [vmem:[#allocation10 + $0x68] sm:$0xff] }
 0x5b0   :  { %v753_v56 = vmul.f32 %v1206_v54, %v748_v51  ;;  %v1537_v57 = vpop.xlane.xlu2 %953  ;;  %vm758_vm1 = vweird.f32 %v1206_v54  ;;  %v771_v0 = vadd.f32 %v1204_v52, %v770_v58  ;;  %1084 = vmatpush.xpose.msrb.mxu1 %v1075_v32  ;;  %v1070_v51 = vld [vmem:[#allocation10 + $0x40] sm:$0xff] }
 0x5b1   :  { %1207 = vrcp.f32 %v1537_v57  ;;  %vm759_vm10 = vmor %vm757_vm7, %vm758_vm1  ;;  %v981_v33 = vand.u32 2147483648, %v1537_v57  ;;  %vm975_vm1 = vweird.f32 %v1537_v57  ;;  %v979_v7 = vand.u32 2147483647, %v1537_v57  ;;  %v1062_v58 = vld [vmem:[#allocation10] sm:$0xff] }
 0x5b2   :  { %v754_v59 = vsub.f32 1.0, %v753_v56  ;;  %v775_v15 = vsel %vm1543_vm11, %v1204_v52, %v771_v0  ;;  %v1069_v52 = vld [vmem:[#allocation10 + $0x38] sm:$0xff]  ;;  %v1064_v56 = vld [vmem:[#allocation10 + $0x10] sm:$0xff] }
 0x5b3   :  { %v780_v27 = vsel %vm777_vm15, %v779_v20, %v775_v15  ;;  %v982_v39 = vor.u32 1.1754944e-38, %v981_v33  ;;  %vm980_vm7 = vcmp.eq.f32.partialorder %v979_v7, 8.507059e+37 }
 0x5b4   :  { %v755_v62 = vmul.f32 %v1206_v54, %v754_v59  ;;  %v781_v35 = vmul.f32 %v1510_v36, %v780_v27  ;;  %1085 = vmatpush.xpose.msrb.mxu1 %v1074_v47 }
 0x5b5   :  { %v785_v1 = vpop.permute.xlu1 %784 }
 0x5b6   :  { %v756_v3 = vadd.f32 %v1206_v54, %v755_v62  ;;  %809 = vmatpush.msrb.mxu3 %v785_v1  ;;  %v1176_v1 = vld [vmem:[%s1594_s5] ss:$0 sm:$0xff] }
 0x5b7   :  { %v1208_v4 = vpop.eup %1207 }
 0x5b8   :  { %v760_v11 = vsel %vm759_vm10, %v1206_v54, %v756_v3  ;;  %v971_v12 = vmul.f32 %v1208_v4, %v1537_v57  ;;  %v990_v13 = vpop.permute.xlu2 %989  ;;  %vm976_vm3 = vweird.f32 %v1208_v4  ;;  %v1066_v54 = vld [vmem:[#allocation10 + $0x20] sm:$0xff]  ;;  %v1063_v57 = vld [vmem:[#allocation10 + $0x8] sm:$0xff] }
 0x5b9   :  { %v765_v16 = vsel %vm762_vm12, %v764_v6, %v760_v11  ;;  %1163 = vmatpush.msk.msra.mxu3 %vm234_vm0, %v990_v13  ;;  %vm977_vm6 = vmor %vm975_vm1, %vm976_vm3 }
 0x5ba   :  { %v972_v21 = vsub.f32 1.0, %v971_v12  ;;  %v766_v22 = vmul.f32 %v1515_v41, %v765_v16 }
 0x5bb   :  { %1012 = vmatpush.msra.mxu3 %v988_v48  ;;  %v1020_v36 = vpop.permute.xlu0 %1019  ;;  %v1073_v48 = vld [vmem:[#allocation10 + $0x58] sm:$0xff] }
 0x5bc   :  { %v973_v28 = vmul.f32 %v1208_v4, %v972_v21  ;;  %1154 = vmatmul.msk.f32.vlgmr.msrb.gmra.mxu3 %vm348_vm2, %v766_v22  ;;  %1086 = vmatpush.xpose.msrb.mxu1 %v1073_v48 }
 0x5bd   :  { %v819_v30 = vpop.permute.xlu1 %818 }
 0x5be   :  { %v974_v31 = vadd.f32 %v1208_v4, %v973_v28  ;;  %1155 = vmatpush.msk.msra.mxu0 %vm234_vm0, %v819_v30 }
 0x5c0   :  { %v646_v37 = vpop.permute.xlu2 %645  ;;  %841 = vmatpush.msra.mxu0 %v1532_v50  ;;  %v978_v38 = vsel %vm977_vm6, %v1208_v4, %v974_v31 }
 0x5c1   :  { %652 = vst.msk [vmem:[#allocation4] sm:$0xff] %vm651_vm5, %v646_v37  ;;  %1156 = vmatmul.msk.f32.vlgmr.msra.gmra.mxu0 %vm348_vm2, %v781_v35  ;;  %v983_v41 = vsel %vm980_vm7, %v982_v39, %v978_v38 }
 0x5c2   :  { %v984_v43 = vmul.f32 %v1519_v44, %v983_v41  ;;  %v1072_v44 = vld [vmem:[#allocation10 + $0x50] sm:$0xff] }
 0x5c3   :  { %1087 = vmatpush.xpose.msrb.mxu1 %v1072_v44 }
 0x5c4   :  { %1164 = vmatmul.msk.f32.vlgmr.msra.gmra.mxu3 %vm348_vm2, %v969_v40 }
 0x5c5   :  { %v1022_v42 = vpop.permute.xlu1 %1021 }
 0x5c6   :  { %1165 = vmatpush.msk.msrb.mxu0 %vm234_vm0, %v1022_v42  ;;  %vm854_vm0 = vcmask 785920  }
 0x5c7   :  { %1088 = vmatpush.xpose.msrb.mxu1 %v1071_v8 }
 0x5c8   :  { %v648_v23 = vpop.permute.xlu2 %647  ;;  %1044 = vmatpush.msrb.mxu0 %v1020_v36 }
 0x5c9   :  { %653 = vst.msk [vmem:[#allocation4 + $0x8] sm:$0xff] %vm651_vm5, %v648_v23  ;;  %1166 = vmatmul.msk.f32.vlgmr.msrb.gmra.mxu0 %vm348_vm2, %v984_v43  ;;  %vm1057_vm2 = vcmask 1048320  }
 0x5cb   :  { %1089 = vmatpush.xpose.msrb.mxu1 %v1070_v51 }
 0x5cf   :  { %1090 = vmatpush.xpose.msrb.mxu1 %v1069_v52 }
 0x5d3   :  { %1091 = vmatpush.xpose.msrb.mxu1 %v1068_v17 }
 0x5d7   :  { %1092 = vmatpush.xpose.msrb.mxu1 %v1067_v26 }
 0x5db   :  { %1093 = vmatpush.xpose.msrb.mxu1 %v1066_v54 }
 0x5df   :  { %1094 = vmatpush.xpose.msrb.mxu1 %v1065_v55 }
 0x5e3   :  { %1095 = vmatpush.xpose.msrb.mxu1 %v1064_v56 }
 0x5e7   :  { %1096 = vmatpush.xpose.msrb.mxu1 %v1063_v57 }
 0x5eb   :  { %1097 = vmatpush.xpose.msrb.mxu1 %v1062_v58 }
 0x63e   :  { %v843_v50 = vpop.f32.mrf.mxu0 }
 0x63f   :  { %v811_v49 = vpop.f32.mrf.mxu3 }
 0x640   :  { %848 = vrot.lane.b32.xlu1 %v811_v49, %s1317_s22 }
 0x646   :  { %v1046_v53 = vpop.f32.mrf.mxu0 }
 0x647   :  { %v1014_v18 = vpop.f32.mrf.mxu3 }
 0x648   :  { %850 = vrot.lane.b32.xlu1 %v843_v50, %s1317_s22  ;;  %1051 = vrot.lane.b32.xlu0 %v1014_v18, %s1316_s0 }
 0x650   :  { %1053 = vrot.lane.b32.xlu0 %v1046_v53, %s1316_s0 }
 0x6b2   :  { %v849_v59 = vpop.permute.xlu1 %848 }
 0x6b3   :  { %855 = vst.msk [vmem:[#allocation4] sm:$0xff] %vm854_vm0, %v849_v59 }
 0x6ba   :  { %v851_v60 = vpop.permute.xlu1 %850  ;;  %v1052_v61 = vpop.permute.xlu0 %1051 }
 0x6bb   :  { %856 = vst.msk [vmem:[#allocation4 + $0x8] sm:$0xff] %vm854_vm0, %v851_v60 }
 0x6bc   :  { %1058 = vst.msk [vmem:[#allocation4] sm:$0xff] %vm1057_vm2, %v1052_v61 }
 0x6c2   :  { %v1054_v62 = vpop.permute.xlu0 %1053 }
 0x6c3   :  { %1059 = vst.msk [vmem:[#allocation4 + $0x8] sm:$0xff] %vm1057_vm2, %v1054_v62  ;;  %v1060_v63 = vld [vmem:[#allocation4] sm:$0xff] }
 0x6c4   :  { %1098 = vmatmul.f32.vlgmr.msrb.gmra.mxu1 %v1060_v63 }
 0x6ca   :  { %v1061_v0 = vld [vmem:[#allocation4 + $0x8] sm:$0xff] }
 0x6cc   :  { %1101 = vmatmul.f32.gmra.mxu1 %v1061_v0 }
 0x741   :  { %v1099_v2 = vpop.f32.mrf.mxu1 }
 0x742   :  { %v1100_v3 = vadd.f32 %v1176_v1, %v1099_v2 }
 0x744   :  { %1105 = vst [vmem:[#allocation11] sm:$0xff] %v1100_v3 }
 0x749   :  { %v1102_v4 = vpop.f32.mrf.mxu1 }
 0x74a   :  { %v1103_v5 = vadd.f32 %v1176_v1, %v1102_v4 }
 0x74c   :  { %1106 = vst [vmem:[#allocation11 + $0x8] sm:$0xff] %v1103_v5 }
 0x74d   :  { %1119 = dma.vmem_to_hbm [thread:$0]  %s1112_s27, 256, %s1114_s8, [#allocation7], %s1312_s29, %s1312_s29, %s1313_s30  }
 0x74e   :  { %1309 = dma.done.wait [#allocation7], 256  }
 0x74f   :  { %1310 = vsyncadd [#allocation7], 4294967040 }
 0x750   :  { %1124 = vsyncpa [#allocation6], 1 }
 0x751   :  { %1125 = vsyncpa [#allocation9], 1 }
 0x752   :  { %1126 = vsyncpa [#allocation7], 1 }

</bundles_post_ra>
